<compile_context>
chip_gen: v7x
topology: tpu7x:2x2x1
jax: 0.10.0
libtpu: 0.0.40
codegen_flags: <defaults>
</compile_context>

<pallas_src>
import jax
import jax.numpy as jnp
from jax.experimental import pallas as pl
from jax.experimental.pallas import tpu as pltpu

_CIN = 16    # point channels 3 -> 16 (zero-padded; one packed bf16 sublane tile)
_C1 = 128    # conv1 out channels 64 -> 128 (zero-padded, lane-dense)


def _encoder_kernel(x_ref,
                    w1_ref, b1_ref,
                    w2_ref, b2_ref,
                    w3_ref, b3_ref,
                    wf1_ref, bf1_ref,
                    wf2_ref, bf2_ref,
                    o_ref,
                    gmax_ref):
    """One grid step = (TB batch elements) x (TN points).

    x_ref   : (TB, 16, TN) bf16   lane-dense point-cloud tile (channels padded)
    o_ref   : (TB, 1, LAT) f32    written on the last point tile only
    gmax_ref: (TB, 256)    bf16   running global-max-pool accumulator
    """
    nk = pl.program_id(1)
    TB, _, TN = x_ref.shape
    C3 = w3_ref.shape[-1]
    f32, bf16 = jnp.float32, jnp.bfloat16

    @pl.when(nk == 0)
    def _():
        # conv3 output is post-ReLU (>= 0), so 0 is a valid identity for max.
        gmax_ref[...] = jnp.zeros(gmax_ref.shape, gmax_ref.dtype)

    xs = x_ref[...]                                            # (TB, 16, TN) bf16

    # conv1 (1x1) + folded BN on the MXU: one tiny K=16 matmul per batch row,
    # in the lhs-transposed (K-major) form (16,TN)^T @ (16,128) -> (TN,128),
    # so the lane-dense input never needs an explicit VPU/XLU transpose.
    hs = []
    for b in range(TB):
        hb = jax.lax.dot_general(
            xs[b], w1_ref[...],
            dimension_numbers=(((0,), (0,)), ((), ())),
            preferred_element_type=f32)                        # (TN, 128) f32
        hs.append(hb.astype(bf16))
    h = hs[0] if TB == 1 else jnp.concatenate(hs, axis=0)      # (TB*TN, 128)
    h = jnp.maximum(h + b1_ref[...], 0)                        # bf16 bias + ReLU

    # conv2 (1x1): (M,128)@(128,128), f32 MXU accumulate, bf16 elementwise
    h = jnp.dot(h, w2_ref[...], preferred_element_type=f32).astype(bf16)
    h = jnp.maximum(h + b2_ref[...], 0)

    # conv3 (1x1): (M,128)@(128,256)
    h = jnp.dot(h, w3_ref[...], preferred_element_type=f32).astype(bf16)
    h = jnp.maximum(h + b3_ref[...], 0)                        # (M, 256) bf16

    # running global max-pool over this tile's TN points
    g_tile = jnp.max(h.reshape(TB, TN, C3), axis=1)            # (TB, 256) bf16
    gmax_ref[...] = jnp.maximum(gmax_ref[...], g_tile)

    # epilogue on the last point tile: fc1 + ReLU, fc2 + tanh
    @pl.when(nk == pl.num_programs(1) - 1)
    def _():
        g = gmax_ref[...]                                      # (TB, 256) bf16
        f = jnp.dot(g, wf1_ref[...],
                    preferred_element_type=f32) + bf1_ref[...]
        f = jnp.maximum(f, 0.0).astype(bf16)
        out = jnp.dot(f, wf2_ref[...],
                      preferred_element_type=f32) + bf2_ref[...]
        o_ref[:, 0, :] = jnp.tanh(out).astype(o_ref.dtype)


def _round_up(v, m):
    return (v + m - 1) // m * m


def deep_sdf_encoder(x, params, *, tb=8, tn=1024):
    """x: (B, N, 3) float32 point clouds.  Returns (B, latent_dim) float32."""
    B, N, C = x.shape
    assert C == 3, "DeepSDFEncoder expects 3-channel point clouds"
    latent_dim = params["wf2"].shape[-1]

    f32, bf16 = jnp.float32, jnp.bfloat16
    C3 = params["w3"].shape[-1]                 # 256
    LAT = _round_up(latent_dim, 128)            # lane-dense output block

    # ---- pad / cast weights (zero padding is exact) ----
    w1 = jnp.pad(params["w1"],
                 ((0, _CIN - 3), (0, _C1 - params["w1"].shape[1]))).astype(bf16)  # (16,128)
    b1 = jnp.pad(params["b1"],
                 ((0, 0), (0, _C1 - params["b1"].shape[1]))).astype(bf16)         # (1,128)
    w2 = jnp.pad(params["w2"],
                 ((0, _C1 - params["w2"].shape[0]), (0, 0))).astype(bf16)         # (128,128)
    b2 = params["b2"].astype(bf16)                                                # (1,128)
    w3 = params["w3"].astype(bf16)                                                # (128,256)
    b3 = params["b3"].astype(bf16)                                                # (1,256)
    wf1 = params["wf1"].astype(bf16)                                              # (256,512)
    bf1 = params["bf1"].astype(f32)                                               # (1,512)
    wf2 = jnp.pad(params["wf2"],
                  ((0, 0), (0, LAT - latent_dim))).astype(bf16)                   # (512,LAT)
    bf2 = jnp.pad(params["bf2"].astype(f32),
                  ((0, 0), (0, LAT - latent_dim)))                                # (1,LAT)

    # ---- tile selection ----
    if N <= tn:
        TN = _round_up(N, 8)
        N_pad = TN
    else:
        TN = tn
        N_pad = _round_up(N, TN)

    if B >= 2 * tb:
        TB = tb
    elif B >= 2:
        TB = (B + 1) // 2          # grid[0] >= 2 so both v7x TensorCores work
    else:
        TB = 1
    B_pad = _round_up(B, TB)

    # (B, N, 3) -> (B, 3, N): point axis lane-dense.  Edge-replicate padded
    # batch rows / points (exact for the max-pool), zero-pad channels 3 -> 16.
    xp = jnp.transpose(x, (0, 2, 1)).astype(bf16)
    if (B_pad, N_pad) != (B, N):
        xp = jnp.pad(xp, ((0, B_pad - B), (0, 0), (0, N_pad - N)), mode="edge")
    xp = jnp.pad(xp, ((0, 0), (0, _CIN - 3), (0, 0)))

    grid = (B_pad // TB, N_pad // TN)

    def _w_spec(arr):
        # full weight block, constant index -> DMA'd once per grid pass
        return pl.BlockSpec(arr.shape, lambda b, n: (0, 0))

    in_specs = [
        pl.BlockSpec((TB, _CIN, TN), lambda b, n: (b, 0, n)),        # x
        _w_spec(w1), _w_spec(b1),
        _w_spec(w2), _w_spec(b2),
        _w_spec(w3), _w_spec(b3),
        _w_spec(wf1), _w_spec(bf1),
        _w_spec(wf2), _w_spec(bf2),
    ]

    out = pl.pallas_call(
        _encoder_kernel,
        out_shape=jax.ShapeDtypeStruct((B_pad, 1, LAT), f32),
        grid_spec=pltpu.PrefetchScalarGridSpec(
            num_scalar_prefetch=0,
            grid=grid,
            in_specs=in_specs,
            out_specs=pl.BlockSpec((TB, 1, LAT), lambda b, n: (b, 0, 0)),
            scratch_shapes=[pltpu.VMEM((TB, C3), bf16)],
        ),
        compiler_params=pltpu.CompilerParams(
            dimension_semantics=("parallel", "arbitrary"),
            # footprint at TB=8, TN=1024 is ~12-18 MiB; 32 MiB leaves headroom
            # and fits v7x's 64 MiB VMEM comfortably.
            vmem_limit_bytes=32 * 1024 * 1024),
    )(xp, w1, b1, w2, b2, w3, b3, wf1, bf1, wf2, bf2)

    return out[:B, 0, :latent_dim]


def init_params(key, latent_dim=256, dtype=jnp.float32):
    """Deterministic synthetic parameters matching DeepSDFEncoder's shapes.

    Conv1d(kernel_size=1) weights are stored as (Cin, Cout) so the kernel can
    right-multiply.  Eval-mode BatchNorm (mean=0, var=1, gamma=1, beta=0,
    eps=1e-5) is folded into each conv's weight and bias.
    """
    keys = jax.random.split(key, 10)
    eps = 1e-5
    bn_scale = 1.0 / jnp.sqrt(1.0 + eps)   # gamma / sqrt(running_var + eps)
    bn_shift = 0.0                         # beta - running_mean * bn_scale

    def lin(kw, kb, cin, cout, scale=0.05):
        w = scale * jax.random.normal(kw, (cin, cout), dtype)
        b = scale * jax.random.normal(kb, (1, cout), dtype)
        return w, b

    w1, b1 = lin(keys[0], keys[1], 3, 64)
    w2, b2 = lin(keys[2], keys[3], 64, 128)
    w3, b3 = lin(keys[4], keys[5], 128, 256)
    wf1, bf1 = lin(keys[6], keys[7], 256, 512)
    wf2, bf2 = lin(keys[8], keys[9], 512, latent_dim)

    # Fold BN into conv1/2/3 (exact eval-mode semantics).
    w1, b1 = w1 * bn_scale, b1 * bn_scale + bn_shift
    w2, b2 = w2 * bn_scale, b2 * bn_scale + bn_shift
    w3, b3 = w3 * bn_scale, b3 * bn_scale + bn_shift

    return dict(w1=w1, b1=b1, w2=w2, b2=b2, w3=w3, b3=b3,
                wf1=wf1, bf1=bf1, wf2=wf2, bf2=bf2)


def reference_forward(x, p):
    """Pure-JAX reference mirroring the kernel's numerics
    (bf16 MXU operands / f32 accumulation, bf16 bias/ReLU/max, f32 fc tail)."""
    f32, bf16 = jnp.float32, jnp.bfloat16

    def mm(a, w):
        return jnp.dot(a.astype(bf16), w.astype(bf16), preferred_element_type=f32)

    B, N, _ = x.shape
    h = mm(x.reshape(B * N, 3), p["w1"]).astype(bf16)
    h = jnp.maximum(h + p["b1"].astype(bf16), 0)
    h = jnp.maximum(mm(h, p["w2"]).astype(bf16) + p["b2"].astype(bf16), 0)
    h = jnp.maximum(mm(h, p["w3"]).astype(bf16) + p["b3"].astype(bf16), 0)
    g = jnp.max(h.reshape(B, N, -1), axis=1)        # global max-pool over points
    f = jnp.maximum(mm(g, p["wf1"]) + p["bf1"], 0.0).astype(bf16)
    out = mm(f, p["wf2"]) + p["bf2"]
    return jnp.tanh(out)


if __name__ == "__main__":
    key = jax.random.PRNGKey(0)
    k_x, k_p = jax.random.split(key)

    B, N, latent_dim = 2, 64, 64          # small shapes; x is (B, num_points, 3)
    x = jax.random.normal(k_x, (B, N, 3), jnp.float32)
    params = init_params(k_p, latent_dim=latent_dim)

    out = deep_sdf_encoder(x, params)
    out = jax.block_until_ready(out)

    ref = reference_forward(x, params)
    assert out.shape == (B, latent_dim)
    err = float(jnp.max(jnp.abs(out - ref.astype(out.dtype))))
    assert err < 2e-2, f"kernel mismatch vs reference: {err}"

    print("KERNEL_OK")
</pallas_src>

<mosaic_0001>
module attributes {stable_mosaic.version = 11 : i64} {
  func.func @_encoder_kernel(%arg0: i32, %arg1: i32, %arg2: memref<1x16x64xbf16, #tpu.memory_space<vmem>>, %arg3: memref<16x128xbf16, #tpu.memory_space<vmem>>, %arg4: memref<1x128xbf16, #tpu.memory_space<vmem>>, %arg5: memref<128x128xbf16, #tpu.memory_space<vmem>>, %arg6: memref<1x128xbf16, #tpu.memory_space<vmem>>, %arg7: memref<128x256xbf16, #tpu.memory_space<vmem>>, %arg8: memref<1x256xbf16, #tpu.memory_space<vmem>>, %arg9: memref<256x512xbf16, #tpu.memory_space<vmem>>, %arg10: memref<1x512xf32, #tpu.memory_space<vmem>>, %arg11: memref<512x128xbf16, #tpu.memory_space<vmem>>, %arg12: memref<1x128xf32, #tpu.memory_space<vmem>>, %arg13: memref<1x1x128xf32, #tpu.memory_space<vmem>>, %arg14: memref<1x256xbf16, #tpu.memory_space<vmem>>) attributes {dimension_semantics = [#tpu.dimension_semantics<parallel>, #tpu.dimension_semantics<arbitrary>], iteration_bounds = array<i64: 2, 1>, scalar_prefetch = 0 : i64, scratch_operands = 1 : i64, tpu.core_type = #tpu.core_type<tc>, window_params = [{transform_indices = @transform_0, window_bounds = array<i64: 1, 16, 64>}, {pipeline_mode = #tpu.pipeline_mode<synchronous>, transform_indices = @transform_1, window_bounds = array<i64: 16, 128>}, {pipeline_mode = #tpu.pipeline_mode<synchronous>, transform_indices = @transform_2, window_bounds = array<i64: 1, 128>}, {pipeline_mode = #tpu.pipeline_mode<synchronous>, transform_indices = @transform_3, window_bounds = array<i64: 128, 128>}, {pipeline_mode = #tpu.pipeline_mode<synchronous>, transform_indices = @transform_4, window_bounds = array<i64: 1, 128>}, {pipeline_mode = #tpu.pipeline_mode<synchronous>, transform_indices = @transform_5, window_bounds = array<i64: 128, 256>}, {pipeline_mode = #tpu.pipeline_mode<synchronous>, transform_indices = @transform_6, window_bounds = array<i64: 1, 256>}, {pipeline_mode = #tpu.pipeline_mode<synchronous>, transform_indices = @transform_7, window_bounds = array<i64: 256, 512>}, {pipeline_mode = #tpu.pipeline_mode<synchronous>, transform_indices = @transform_8, window_bounds = array<i64: 1, 512>}, {pipeline_mode = #tpu.pipeline_mode<synchronous>, transform_indices = @transform_9, window_bounds = array<i64: 512, 128>}, {pipeline_mode = #tpu.pipeline_mode<synchronous>, transform_indices = @transform_10, window_bounds = array<i64: 1, 128>}, {transform_indices = @transform_11, window_bounds = array<i64: 1, 1, 128>}]} {
    %c0_i32 = arith.constant 0 : i32
    %0 = arith.cmpi eq, %arg1, %c0_i32 : i32
    %1 = arith.extui %0 : i1 to i32
    %c0_i32_0 = arith.constant 0 : i32
    %2 = arith.cmpi ne, %1, %c0_i32_0 : i32
    scf.if %2 {
      %cst_27 = arith.constant 0.000000e+00 : bf16
      %37 = vector.broadcast %cst_27 : bf16 to vector<1x256xbf16>
      %c0_28 = arith.constant 0 : index
      %c0_29 = arith.constant 0 : index
      %38 = vector.load %arg14[%c0_28, %c0_29] : memref<1x256xbf16, #tpu.memory_space<vmem>>, vector<1x256xbf16>
      tpu.vector_store %arg14[%c0_28, %c0_29], %37 {strides = array<i32>} : memref<1x256xbf16, #tpu.memory_space<vmem>>, vector<1x256xbf16>,
    } else {
    }
    %c0 = arith.constant 0 : index
    %c0_1 = arith.constant 0 : index
    %c0_2 = arith.constant 0 : index
    %3 = vector.load %arg2[%c0, %c0_1, %c0_2] : memref<1x16x64xbf16, #tpu.memory_space<vmem>>, vector<1x16x64xbf16>
    %4 = vector.shape_cast %3 : vector<1x16x64xbf16> to vector<16x64xbf16>
    %c0_3 = arith.constant 0 : index
    %c0_4 = arith.constant 0 : index
    %5 = vector.load %arg3[%c0_3, %c0_4] : memref<16x128xbf16, #tpu.memory_space<vmem>>, vector<16x128xbf16>
    %cst = arith.constant dense<0.000000e+00> : vector<64x128xf32>
    %6 = tpu.matmul %4, %5, %cst {dimension_numbers = #tpu.dot_dimension_numbers<[0], [0], [1], [1], [0, 1, 1, 1], [], []>} : vector<16x64xbf16>, vector<16x128xbf16>, vector<64x128xf32> -> vector<64x128xf32>
    %7 = arith.truncf %6 : vector<64x128xf32> to vector<64x128xbf16>
    %c0_5 = arith.constant 0 : index
    %c0_6 = arith.constant 0 : index
    %8 = vector.load %arg4[%c0_5, %c0_6] : memref<1x128xbf16, #tpu.memory_space<vmem>>, vector<1x128xbf16>
    %9 = vector.broadcast %8 : vector<1x128xbf16> to vector<64x128xbf16>
    %10 = arith.addf %7, %9 : vector<64x128xbf16>
    %cst_7 = arith.constant 0.000000e+00 : bf16
    %11 = vector.broadcast %cst_7 : bf16 to vector<64x128xbf16>
    %12 = arith.maximumf %10, %11 : vector<64x128xbf16>
    %c0_8 = arith.constant 0 : index
    %c0_9 = arith.constant 0 : index
    %13 = vector.load %arg5[%c0_8, %c0_9] : memref<128x128xbf16, #tpu.memory_space<vmem>>, vector<128x128xbf16>
    %cst_10 = arith.constant dense<0.000000e+00> : vector<64x128xf32>
    %14 = tpu.matmul %12, %13, %cst_10 {dimension_numbers = #tpu.dot_dimension_numbers<[1], [0], [0], [1], [0, 0, 1, 1], [], []>} : vector<64x128xbf16>, vector<128x128xbf16>, vector<64x128xf32> -> vector<64x128xf32>
    %15 = arith.truncf %14 : vector<64x128xf32> to vector<64x128xbf16>
    %c0_11 = arith.constant 0 : index
    %c0_12 = arith.constant 0 : index
    %16 = vector.load %arg6[%c0_11, %c0_12] : memref<1x128xbf16, #tpu.memory_space<vmem>>, vector<1x128xbf16>
    %17 = vector.broadcast %16 : vector<1x128xbf16> to vector<64x128xbf16>
    %18 = arith.addf %15, %17 : vector<64x128xbf16>
    %cst_13 = arith.constant 0.000000e+00 : bf16
    %19 = vector.broadcast %cst_13 : bf16 to vector<64x128xbf16>
    %20 = arith.maximumf %18, %19 : vector<64x128xbf16>
    %c0_14 = arith.constant 0 : index
    %c0_15 = arith.constant 0 : index
    %21 = vector.load %arg7[%c0_14, %c0_15] : memref<128x256xbf16, #tpu.memory_space<vmem>>, vector<128x256xbf16>
    %cst_16 = arith.constant dense<0.000000e+00> : vector<64x256xf32>
    %22 = tpu.matmul %20, %21, %cst_16 {dimension_numbers = #tpu.dot_dimension_numbers<[1], [0], [0], [1], [0, 0, 1, 1], [], []>} : vector<64x128xbf16>, vector<128x256xbf16>, vector<64x256xf32> -> vector<64x256xf32>
    %23 = arith.truncf %22 : vector<64x256xf32> to vector<64x256xbf16>
    %c0_17 = arith.constant 0 : index
    %c0_18 = arith.constant 0 : index
    %24 = vector.load %arg8[%c0_17, %c0_18] : memref<1x256xbf16, #tpu.memory_space<vmem>>, vector<1x256xbf16>
    %25 = vector.broadcast %24 : vector<1x256xbf16> to vector<64x256xbf16>
    %26 = arith.addf %23, %25 : vector<64x256xbf16>
    %cst_19 = arith.constant 0.000000e+00 : bf16
    %27 = vector.broadcast %cst_19 : bf16 to vector<64x256xbf16>
    %28 = arith.maximumf %26, %27 : vector<64x256xbf16>
    %29 = vector.shape_cast %28 : vector<64x256xbf16> to vector<1x64x256xbf16>
    %cst_20 = arith.constant dense<0xFF80> : vector<1x256xbf16>
    %30 = vector.multi_reduction <maximumf>, %29, %cst_20 [1] : vector<1x64x256xbf16> to vector<1x256xbf16>
    %c0_21 = arith.constant 0 : index
    %c0_22 = arith.constant 0 : index
    %31 = vector.load %arg14[%c0_21, %c0_22] : memref<1x256xbf16, #tpu.memory_space<vmem>>, vector<1x256xbf16>
    %32 = arith.maximumf %31, %30 : vector<1x256xbf16>
    %c0_23 = arith.constant 0 : index
    %c0_24 = arith.constant 0 : index
    %33 = vector.load %arg14[%c0_23, %c0_24] : memref<1x256xbf16, #tpu.memory_space<vmem>>, vector<1x256xbf16>
    tpu.vector_store %arg14[%c0_23, %c0_24], %32 {strides = array<i32>} : memref<1x256xbf16, #tpu.memory_space<vmem>>, vector<1x256xbf16>,
    %c0_i32_25 = arith.constant 0 : i32
    %34 = arith.cmpi eq, %arg1, %c0_i32_25 : i32
    %35 = arith.extui %34 : i1 to i32
    %c0_i32_26 = arith.constant 0 : i32
    %36 = arith.cmpi ne, %35, %c0_i32_26 : i32
    scf.if %36 {
      %c0_27 = arith.constant 0 : index
      %c0_28 = arith.constant 0 : index
      %37 = vector.load %arg14[%c0_27, %c0_28] : memref<1x256xbf16, #tpu.memory_space<vmem>>, vector<1x256xbf16>
      %c0_29 = arith.constant 0 : index
      %c0_30 = arith.constant 0 : index
      %38 = vector.load %arg9[%c0_29, %c0_30] : memref<256x512xbf16, #tpu.memory_space<vmem>>, vector<256x512xbf16>
      %cst_31 = arith.constant dense<0.000000e+00> : vector<1x512xf32>
      %39 = tpu.matmul %37, %38, %cst_31 {dimension_numbers = #tpu.dot_dimension_numbers<[1], [0], [0], [1], [0, 0, 1, 1], [], []>} : vector<1x256xbf16>, vector<256x512xbf16>, vector<1x512xf32> -> vector<1x512xf32>
      %c0_32 = arith.constant 0 : index
      %c0_33 = arith.constant 0 : index
      %40 = vector.load %arg10[%c0_32, %c0_33] : memref<1x512xf32, #tpu.memory_space<vmem>>, vector<1x512xf32>
      %41 = arith.addf %39, %40 : vector<1x512xf32>
      %cst_34 = arith.constant 0.000000e+00 : f32
      %42 = vector.broadcast %cst_34 : f32 to vector<1x512xf32>
      %43 = arith.maximumf %41, %42 : vector<1x512xf32>
      %44 = arith.truncf %43 : vector<1x512xf32> to vector<1x512xbf16>
      %c0_35 = arith.constant 0 : index
      %c0_36 = arith.constant 0 : index
      %45 = vector.load %arg11[%c0_35, %c0_36] : memref<512x128xbf16, #tpu.memory_space<vmem>>, vector<512x128xbf16>
      %cst_37 = arith.constant dense<0.000000e+00> : vector<1x128xf32>
      %46 = tpu.matmul %44, %45, %cst_37 {dimension_numbers = #tpu.dot_dimension_numbers<[1], [0], [0], [1], [0, 0, 1, 1], [], []>} : vector<1x512xbf16>, vector<512x128xbf16>, vector<1x128xf32> -> vector<1x128xf32>
      %c0_38 = arith.constant 0 : index
      %c0_39 = arith.constant 0 : index
      %47 = vector.load %arg12[%c0_38, %c0_39] : memref<1x128xf32, #tpu.memory_space<vmem>>, vector<1x128xf32>
      %48 = arith.addf %46, %47 : vector<1x128xf32>
      %49 = math.tanh %48 : vector<1x128xf32>
      %c0_40 = arith.constant 0 : index
      %c0_41 = arith.constant 0 : index
      %c0_42 = arith.constant 0 : index
      %50 = vector.load %arg13[%c0_40, %c0_41, %c0_42] : memref<1x1x128xf32, #tpu.memory_space<vmem>>, vector<1x1x128xf32>
      %51 = vector.shape_cast %50 : vector<1x1x128xf32> to vector<1x128xf32>
      %52 = vector.shape_cast %49 : vector<1x128xf32> to vector<1x1x128xf32>
      tpu.vector_store %arg13[%c0_40, %c0_41, %c0_42], %52 {strides = array<i32>} : memref<1x1x128xf32, #tpu.memory_space<vmem>>, vector<1x1x128xf32>,
    } else {
    }
    return
  }
  func.func @transform_0(%arg0: i32, %arg1: i32) -> (i32, i32, i32) {
    %c0_i32 = arith.constant 0 : i32
    %c0_i32_0 = arith.constant 0 : i32
    return %arg0, %c0_i32, %arg1 : i32, i32, i32
  }
  func.func @transform_1(%arg0: i32, %arg1: i32) -> (i32, i32) {
    %c0_i32 = arith.constant 0 : i32
    %c0_i32_0 = arith.constant 0 : i32
    %c0_i32_1 = arith.constant 0 : i32
    return %c0_i32, %c0_i32_0 : i32, i32
  }
  func.func @transform_2(%arg0: i32, %arg1: i32) -> (i32, i32) {
    %c0_i32 = arith.constant 0 : i32
    %c0_i32_0 = arith.constant 0 : i32
    %c0_i32_1 = arith.constant 0 : i32
    return %c0_i32, %c0_i32_0 : i32, i32
  }
  func.func @transform_3(%arg0: i32, %arg1: i32) -> (i32, i32) {
    %c0_i32 = arith.constant 0 : i32
    %c0_i32_0 = arith.constant 0 : i32
    %c0_i32_1 = arith.constant 0 : i32
    return %c0_i32, %c0_i32_0 : i32, i32
  }
  func.func @transform_4(%arg0: i32, %arg1: i32) -> (i32, i32) {
    %c0_i32 = arith.constant 0 : i32
    %c0_i32_0 = arith.constant 0 : i32
    %c0_i32_1 = arith.constant 0 : i32
    return %c0_i32, %c0_i32_0 : i32, i32
  }
  func.func @transform_5(%arg0: i32, %arg1: i32) -> (i32, i32) {
    %c0_i32 = arith.constant 0 : i32
    %c0_i32_0 = arith.constant 0 : i32
    %c0_i32_1 = arith.constant 0 : i32
    return %c0_i32, %c0_i32_0 : i32, i32
  }
  func.func @transform_6(%arg0: i32, %arg1: i32) -> (i32, i32) {
    %c0_i32 = arith.constant 0 : i32
    %c0_i32_0 = arith.constant 0 : i32
    %c0_i32_1 = arith.constant 0 : i32
    return %c0_i32, %c0_i32_0 : i32, i32
  }
  func.func @transform_7(%arg0: i32, %arg1: i32) -> (i32, i32) {
    %c0_i32 = arith.constant 0 : i32
    %c0_i32_0 = arith.constant 0 : i32
    %c0_i32_1 = arith.constant 0 : i32
    return %c0_i32, %c0_i32_0 : i32, i32
  }
  func.func @transform_8(%arg0: i32, %arg1: i32) -> (i32, i32) {
    %c0_i32 = arith.constant 0 : i32
    %c0_i32_0 = arith.constant 0 : i32
    %c0_i32_1 = arith.constant 0 : i32
    return %c0_i32, %c0_i32_0 : i32, i32
  }
  func.func @transform_9(%arg0: i32, %arg1: i32) -> (i32, i32) {
    %c0_i32 = arith.constant 0 : i32
    %c0_i32_0 = arith.constant 0 : i32
    %c0_i32_1 = arith.constant 0 : i32
    return %c0_i32, %c0_i32_0 : i32, i32
  }
  func.func @transform_10(%arg0: i32, %arg1: i32) -> (i32, i32) {
    %c0_i32 = arith.constant 0 : i32
    %c0_i32_0 = arith.constant 0 : i32
    %c0_i32_1 = arith.constant 0 : i32
    return %c0_i32, %c0_i32_0 : i32, i32
  }
  func.func @transform_11(%arg0: i32, %arg1: i32) -> (i32, i32, i32) {
    %c0_i32 = arith.constant 0 : i32
    %c0_i32_0 = arith.constant 0 : i32
    %c0_i32_1 = arith.constant 0 : i32
    return %arg0, %c0_i32, %c0_i32_0 : i32, i32, i32
  }
}

</mosaic_0001>

<bundles_post_ra>
// kernel: tpu_custom_call.1
= control target key start
LH: loop header
LB: loop body
LE: loop exit
PB: predicated region body
PF: predicated region fallthrough
CT: control target
= control target key end

     0   :  { %s3361_s0 = inlined_call_operand.hbm [shape: bf16[2,16,64], index: 0, kind: input, shape index: {}]   ;;  %s3362_s1 = inlined_call_operand.hbm [shape: bf16[16,128], index: 1, kind: input, shape index: {}]   ;;  %s3363_s2 = inlined_call_operand.vmem [shape: bf16[1,128], index: 2, kind: input, shape index: {}]   ;;  %s3364_s3 = inlined_call_operand.hbm [shape: bf16[128,128], index: 3, kind: input, shape index: {}]   ;;  %s3365_s4 = inlined_call_operand.vmem [shape: bf16[1,128], index: 4, kind: input, shape index: {}]   ;;  %s3366_s5 = inlined_call_operand.hbm [shape: bf16[128,256], index: 5, kind: input, shape index: {}]   ;;  %s3367_s6 = inlined_call_operand.vmem [shape: bf16[1,256], index: 6, kind: input, shape index: {}]   ;;  %s3368_s7 = inlined_call_operand.hbm [shape: bf16[256,512], index: 7, kind: input, shape index: {}]   ;;  %s3369_s8 = inlined_call_operand.vmem [shape: f32[1,512], index: 8, kind: input, shape index: {}]   ;;  %s3370_s9 = inlined_call_operand.hbm [shape: bf16[512,128], index: 9, kind: input, shape index: {}]   ;;  %s3371_s10 = inlined_call_operand.vmem [shape: f32[1,128], index: 10, kind: input, shape index: {}]   ;;  %s3372_s11 = inlined_call_operand.hbm [shape: f32[2,1,128], index: 11, kind: output, shape index: {}]  }
   0x1   :  { %3383 = sst [smem:[#allocation21_spill]] %s3362_s1 }
   0x2   :  { %3384 = sst [smem:[#allocation22_spill]] %s3364_s3 }
   0x3   :  { %3385 = sst [smem:[#allocation23_spill]] %s3366_s5 }
   0x4   :  { %3386 = sst [smem:[#allocation24_spill]] %s3369_s8 }
   0x5   :  { %3387 = sst [smem:[#allocation25_spill]] %s3371_s10 }
   0x6   :  { %3388 = sst [smem:[#allocation26_spill]] %s3372_s11 }
   0x7   :  { %16 = vsyncpa [#allocation4], 0 }
   0x8   :  { %18 = vsyncpa [#allocation4 + $0x1], 0 }
   0x9   :  { %19 = vsyncpa [#allocation7], 0 }
   0xa   :  { %20 = vsyncpa [#allocation10], 0 }
   0xb   :  { %21 = vsyncpa [#allocation13], 0 }
   0xc   :  { %22 = vsyncpa [#allocation5], 0 }
   0xd   :  { %24 = vsyncpa [#allocation5 + $0x1], 0  ;;  %s2945_s17 = smov 0   ;;  %s2947_s18 = smov 0  }
   0xe   :  { %s2949_s19 = smov 0   ;;  %s2951_s20 = smov 0  }
   0xf   :  { %s2953_s21 = smov 0   ;;  %s2955_s22 = smov 0  }
  0x10 LB: > { %3389 = sst [smem:[#allocation20_spill]] %s2860_s20  ;;  %s3373_s23 = sadd.s32 4294967295, %s2868_s22   ;;  %s2868_s22 = sphi %s2955_s22, %s30_s22   ;;  %s2864_s21 = sphi %s2953_s21, %s3423_s21   ;;  %s2860_s20 = sphi %s2951_s20, %s3422_s20   ;;  %s2856_s19 = sphi %s2949_s19, %s3421_s19   ;;  %s2852_s18 = sphi %s2947_s18, %s3420_s18   ;;  %s2848_s17 = sphi %s2945_s17, %s3419_s17  }
  0x11   : > { %p2075_p0 = scmp.ge.s32.totalorder %s2868_s22, 1  ;;  %p2979_p1 = scmp.eq.s32.totalorder %s3373_s23, 0 }
  0x12   : > { %p311_p2 = scmp.lt.s32.totalorder %s2868_s22, 3  ;;  %s2870_s26 = smov [#allocation6]  }
  0x13   : > { %s3390_s24 = scalar_select %p2979_p1, 1, 0 }
  0x14   : > { %p2984_p3 = pnand %p2075_p0, %p311_p2  ;;  %s323_s27 = sshll.u32 %s2870_s26, 4  ;;  %s2988_s27 = int_to_ptr.vmem [resolvable:$true] %s323_s27 }
  0x15   : > { %s2871_s29 = smov [#allocation9]   ;;  %s3393_s1 = sld [smem:[#allocation21_spill]] }
  0x16   : > { %s3391_s25 = scalar_select %p2984_p3, 1, 0 }
  0x17   : > { %p2343_p4 = pneg %p2984_p3  ;;  %s355_s30 = sshll.u32 %s2871_s29, 4  ;;  %s2999_s30 = int_to_ptr.vmem [resolvable:$true] %s355_s30 }
  0x19   : > { %p2995_p6 = pnand %p2343_p4, %p2979_p1 }
  0x1b   : > { %s2604_s14 = scalar_lea.hbm %s3393_s1, 128  ;;  %p3009_p8 = pneg %p2995_p6 }
  0x1c   : > { %p2605_p7 = scmp.ne.s32.totalorder %s3393_s1, %s2604_s14  ;;  %p2611_p11 = scmp.lt.u32.totalorder %s2604_s14, %s3393_s1 }
  0x1e   : > { %p2607_p9 = pnand %p3009_p8, %p2605_p7 }
  0x20   : > { %p2608_p10 = pneg %p2607_p9 }
  0x22   : > { %p2613_p12 = pnand %p2611_p11, %p2608_p10 }
  0x24   : > { %2616 = shalt.err (!%p2613_p12)
}
  0x25   : > { %s2617_s12 = scalar_lea.vmem %s2988_s27, 128  ;;  %p2625_p4 = scmp.lt.s32.totalorder %s2988_s27, %s2988_s27 }
  0x26   : > { %p2618_p13 = scmp.ne.s32.totalorder %s2988_s27, %s2617_s12  ;;  %p2626_p5 = scmp.lt.s32.totalorder %s2617_s12, %s2617_s12 }
  0x28   : > { %p2620_p0 = pnand %p2618_p13, %p3009_p8  ;;  %p2627_p7 = por %p2626_p5, %p2625_p4 }
  0x2a   : > { %p2621_p2 = pneg %p2620_p0 }
  0x2c   : > { %p2628_p9 = pnand %p2627_p7, %p2621_p2 }
  0x2e   : > { %2631 = shalt.err (!%p2628_p9)
}
  0x2f   : > { %s3375_s13 = smov 64   ;;  %s3377_s23 = smov 4  }
  0x30   : > { %2346 = dma.hbm_to_vmem [thread:$0]  (!%p2995_p6), %s3393_s1, 128, %s2988_s27, [#allocation7], %s3375_s13, %s3375_s13, %s3377_s23  }
  0x31   : > { %s3395_s5 = sld [smem:[#allocation23_spill]] }
  0x37   : > { %s2632_s12 = scalar_lea.hbm %s3395_s5, 2048 }
  0x38   : > { %p2633_p5 = scmp.ne.s32.totalorder %s3395_s5, %s2632_s12  ;;  %p2639_p12 = scmp.lt.u32.totalorder %s2632_s12, %s3395_s5 }
  0x3a   : > { %p2635_p10 = pnand %p2633_p5, %p3009_p8 }
  0x3c   : > { %p2636_p11 = pneg %p2635_p10 }
  0x3e   : > { %p2641_p13 = pnand %p2639_p12, %p2636_p11 }
  0x40   : > { %2644 = shalt.err (!%p2641_p13)
}
  0x41   : > { %s2645_s27 = scalar_lea.vmem %s2999_s30, 2048  ;;  %p2653_p7 = scmp.lt.s32.totalorder %s2999_s30, %s2999_s30 }
  0x42   : > { %p2646_p0 = scmp.ne.s32.totalorder %s2999_s30, %s2645_s27  ;;  %p2654_p9 = scmp.lt.s32.totalorder %s2645_s27, %s2645_s27 }
  0x44   : > { %p2648_p2 = pnand %p2646_p0, %p3009_p8  ;;  %p2655_p5 = por %p2654_p9, %p2653_p7 }
  0x46   : > { %p2649_p4 = pneg %p2648_p2 }
  0x48   : > { %p2656_p10 = pnand %p2655_p5, %p2649_p4 }
  0x4a   : > { %2659 = shalt.err (!%p2656_p10)
}
  0x4b   : > { %s2874_s10 = smov 128   ;;  %s2875_s8 = smov 8  }
  0x4c   : > { %2352 = dma.hbm_to_vmem [thread:$0]  (!%p2995_p6), %s3395_s5, 2048, %s2999_s30, [#allocation10], %s2874_s10, %s2874_s10, %s2875_s8  }
  0x4d   : > { %s2876_s14 = smov [#allocation8]   ;;  %s2877_s16 = smov [#allocation11]  }
  0x4e   : > { %s339_s15 = sshll.u32 %s2876_s14, 4  ;;  %s371_s29 = sshll.u32 %s2877_s16, 4  ;;  %s340_s15 = int_to_ptr.vmem [resolvable:$true] %s339_s15  ;;  %s3056_s29 = int_to_ptr.vmem [resolvable:$true] %s371_s29 }
  0x4f   : > { %s3396_s3 = sld [smem:[#allocation22_spill]] }
  0x55   : > { %s2660_s13 = scalar_lea.hbm %s3396_s3, 1024 }
  0x56   : > { %p2661_p11 = scmp.ne.s32.totalorder %s3396_s3, %s2660_s13  ;;  %p2667_p0 = scmp.lt.u32.totalorder %s2660_s13, %s3396_s3 }
  0x58   : > { %p2663_p12 = pnand %p2661_p11, %p3009_p8 }
  0x5a   : > { %p2664_p13 = pneg %p2663_p12 }
  0x5c   : > { %p2669_p2 = pnand %p2667_p0, %p2664_p13 }
  0x5e   : > { %2672 = shalt.err (!%p2669_p2)
}
  0x5f   : > { %s2673_s10 = scalar_lea.vmem %s340_s15, 1024  ;;  %p2681_p5 = scmp.lt.s32.totalorder %s340_s15, %s340_s15 }
  0x60   : > { %p2674_p4 = scmp.ne.s32.totalorder %s340_s15, %s2673_s10  ;;  %p2682_p10 = scmp.lt.s32.totalorder %s2673_s10, %s2673_s10 }
  0x62   : > { %p2676_p7 = pnand %p2674_p4, %p3009_p8  ;;  %p2683_p3 = por %p2682_p10, %p2681_p5 }
  0x64   : > { %p2677_p9 = pneg %p2676_p7 }
  0x66   : > { %p2684_p1 = pnand %p2683_p3, %p2677_p9 }
  0x68   : > { %2687 = shalt.err (!%p2684_p1)
}
  0x69   : > { %s3397_s1 = smov 4   ;;  %s3398_s23 = smov 64  }
  0x6a   : > { %2349 = dma.hbm_to_vmem [thread:$0]  (!%p2995_p6), %s3396_s3, 1024, %s340_s15, [#allocation7], %s3398_s23, %s3398_s23, %s3397_s1  }
  0x6b   : > { %s2688_s16 = scalar_lea.hbm %s3368_s7, 8192 }
  0x6c   : > { %p2689_p11 = scmp.ne.s32.totalorder %s3368_s7, %s2688_s16  ;;  %p2695_p12 = scmp.lt.u32.totalorder %s2688_s16, %s3368_s7 }
  0x6e   : > { %p2691_p1 = pnand %p2689_p11, %p3009_p8 }
  0x70   : > { %p2692_p3 = pneg %p2691_p1 }
  0x72   : > { %p2697_p13 = pnand %p2695_p12, %p2692_p3 }
  0x74   : > { %2700 = shalt.err (!%p2697_p13)
}
  0x75   : > { %s2701_s15 = scalar_lea.vmem %s3056_s29, 8192  ;;  %p2709_p7 = scmp.lt.s32.totalorder %s3056_s29, %s3056_s29 }
  0x76   : > { %p2702_p0 = scmp.ne.s32.totalorder %s3056_s29, %s2701_s15  ;;  %p2710_p9 = scmp.lt.s32.totalorder %s2701_s15, %s2701_s15 }
  0x78   : > { %p2704_p2 = pnand %p2702_p0, %p3009_p8  ;;  %p2711_p5 = por %p2710_p9, %p2709_p7 }
  0x7a   : > { %p2705_p4 = pneg %p2704_p2 }
  0x7c   : > { %p2712_p10 = pnand %p2711_p5, %p2705_p4 }
  0x7e   : > { %2715 = shalt.err (!%p2712_p10)
}
  0x7f   : > { %s2878_s10 = smov 256   ;;  %s2879_s8 = smov 16  }
  0x80   : > { %2355 = dma.hbm_to_vmem [thread:$0]  (!%p2995_p6), %s3368_s7, 8192, %s3056_s29, [#allocation10], %s2878_s10, %s2878_s10, %s2879_s8  }
  0x81   : > { %s2880_s14 = smov [#allocation12]   ;;  %s2716_s11 = scalar_lea.hbm %s3370_s9, 4096 }
  0x82   : > { %s387_s16 = sshll.u32 %s2880_s14, 4  ;;  %p2717_p11 = scmp.ne.s32.totalorder %s3370_s9, %s2716_s11  ;;  %s388_s16 = int_to_ptr.vmem [resolvable:$true] %s387_s16 }
  0x83   : > { %p2723_p12 = scmp.lt.u32.totalorder %s2716_s11, %s3370_s9 }
  0x84   : > { %p2719_p1 = pnand %p2717_p11, %p3009_p8 }
  0x86   : > { %p2720_p3 = pneg %p2719_p1 }
  0x88   : > { %p2725_p13 = pnand %p2723_p12, %p2720_p3 }
  0x8a   : > { %2728 = shalt.err (!%p2725_p13)
}
  0x8b   : > { %s2729_s29 = scalar_lea.vmem %s388_s16, 4096  ;;  %p2737_p7 = scmp.lt.s32.totalorder %s388_s16, %s388_s16 }
  0x8c   : > { %p2730_p0 = scmp.ne.s32.totalorder %s388_s16, %s2729_s29  ;;  %p2738_p9 = scmp.lt.s32.totalorder %s2729_s29, %s2729_s29 }
  0x8e   : > { %p2732_p2 = pnand %p2730_p0, %p3009_p8  ;;  %p2739_p5 = por %p2738_p9, %p2737_p7 }
  0x90   : > { %p2733_p4 = pneg %p2732_p2 }
  0x92   : > { %p2740_p10 = pnand %p2739_p5, %p2733_p4 }
  0x94   : > { %2743 = shalt.err (!%p2740_p10)
}
  0x95   : > { %2358 = dma.hbm_to_vmem [thread:$0]  (!%p2995_p6), %s3370_s9, 4096, %s388_s16, [#allocation13], %s3398_s23, %s3398_s23, %s3397_s1  }
  0x96   : > { %s2074_s28 = sadd.s32 4294967294, %s2868_s22   ;;  %s42_s26 = sadd.s32 1, %s2864_s21 }
  0x97   : > { %s51_s10 = sadd.s32 1, %s2856_s19  ;;  %p44_p8 = scmp.ge.s32.totalorder %s42_s26, 2 }
  0x98   : > { %p58_p11 = scmp.ne.s32.totalorder %s2856_s19, %s2852_s18  ;;  %p59_p1 = scmp.eq.s32.totalorder %s2868_s22, 0 }
  0x99   : > { %p64_p3 = scmp.ne.s32.totalorder %s2852_s18, %s2848_s17  ;;  %s3425_s26 = smov (%p44_p8, %s42_s26), 0 }
  0x9a   : > { %p3133_p12 = por %p59_p1, %p58_p11  ;;  %p3400_p13 = scmp.ne.s32.totalorder %s3390_s24, 0 }
  0x9b   : > { %s46_s20 = ssub.s32 %s2864_s21, %s3425_s26  ;;  %s3402_s14 = sadd.s32 4294967295, %s2868_s22  }
  0x9c   : > { %p3139_p6 = por %p3400_p13, %p64_p3  ;;  %p298_p0 = scmp.eq.s32.totalorder %s3402_s14, 1 }
  0x9d   : > { %p49_p2 = scmp.eq.s32.totalorder %s46_s20, 0  ;;  %p304_p4 = scmp.eq.s32.totalorder %s2074_s28, 1 }
  0x9e   : > { %p3147_p7 = por %p298_p0, %p58_p11  ;;  %p2372_p9 = scmp.lt.s32.totalorder %s2868_s22, 2 }
  0x9f   : > { %s3153_s12 = scalar_select %p49_p2, %s2856_s19, %s51_s10  }
  0xa0   : > { %s3403_s16 = scalar_select %p3147_p7, 1, 0 }
  0xa1   : > { %p3155_p5 = por %p304_p4, %p64_p3  ;;  %s404_s11 = sand.u32 1, %s2856_s19  }
  0xa2   : > { %s2082_s30 = sshll.u32 %s404_s11, 3  ;;  %s2223_s15 = sshll.u32 %s2864_s21, 7 }
  0xa3   : > { %s3404_s27 = scalar_select %p3155_p5, 1, 0 }
  0xa4   : > { %s3164_s5 = scalar_lea.hbm %s3361_s0, %s2223_s15  ;;  %s408_s28 = scalar_lea.vmem [#allocation3], %s2082_s30 }
  0xa5   : > { %s416_s20 = sshll.u32 %s408_s28, 4  ;;  %p3170_p10 = pnand %p2372_p9, %p3133_p12  ;;  %s3166_s20 = int_to_ptr.vmem [resolvable:$true] %s416_s20 }
  0xa6   : > { %s3174_s14 = scalar_lea.sflag [#allocation4], %s404_s11  ;;  %s2744_s29 = scalar_lea.hbm %s3164_s5, 128 }
  0xa7   : > { %p2745_p8 = scmp.ne.s32.totalorder %s3164_s5, %s2744_s29  ;;  %p2746_p11 = pneg %p3170_p10 }
  0xa8   : > { %s2749_s8 = scalar_lea.hbm %s3361_s0, 256  ;;  %p2750_p12 = scmp.lt.u32.totalorder %s3164_s5, %s3361_s0 }
  0xa9   : > { %p2747_p1 = pnand %p2746_p11, %p2745_p8  ;;  %p2751_p13 = scmp.lt.u32.totalorder %s2749_s8, %s2744_s29 }
  0xaa   : > { %p2753_p2 = scmp.lt.u32.totalorder %s2744_s29, %s3164_s5 }
  0xab   : > { %p2748_p3 = pneg %p2747_p1  ;;  %p2752_p0 = por %p2751_p13, %p2750_p12 }
  0xad   : > { %p2754_p4 = por %p2753_p2, %p2752_p0 }
  0xaf   : > { %p2755_p9 = pnand %p2754_p4, %p2748_p3 }
  0xb1   : > { %2758 = shalt.err (!%p2755_p9)
}
  0xb2   : > { %s2759_s11 = scalar_lea.vmem %s3166_s20, 128  ;;  %s2881_s30 = smov [#allocation3]  }
  0xb3   : > { %p2760_p8 = scmp.ne.s32.totalorder %s3166_s20, %s2759_s11  ;;  %s2764_s15 = sshll.u32 %s2881_s30, 4  ;;  %s2765_s15 = int_to_ptr.vmem [resolvable:$false] %s2764_s15 }
  0xb4   : > { %s2766_s3 = scalar_lea.vmem %s2765_s15, 256  ;;  %p2767_p7 = scmp.lt.s32.totalorder %s3166_s20, %s2765_s15 }
  0xb5   : > { %p2762_p1 = pnand %p2760_p8, %p2746_p11  ;;  %p2768_p12 = scmp.lt.s32.totalorder %s2766_s3, %s2759_s11 }
  0xb7   : > { %p2763_p5 = pneg %p2762_p1  ;;  %p2769_p13 = por %p2768_p12, %p2767_p7 }
  0xb9   : > { %p2770_p0 = pnand %p2769_p13, %p2763_p5 }
  0xbb   : > { %2773 = shalt.err (!%p2770_p0)
}
  0xbc   : > { %2362 = dma.hbm_to_vmem [thread:$0]  (!%p3170_p10), %s3164_s5, 128, %s3166_s20, %s3174_s14, %s3398_s23, %s3398_s23, %s3397_s1  }
  0xbd   : > { %p3406_p11 = scmp.ne.s32.totalorder %s3391_s25, 0 }
  0xbe   : > { %s3208_s29 = sand.u32 (!%p3406_p11), 1, %s2852_s18  }
  0xbf   : > { %428 = sbr.rel (%p3406_p11) target bundleno = 1510 (0x5e6), region = 64  ;;  %s2086_s8 = sshll.u32 (!%p3406_p11), %s3208_s29, 3 }
  0xc0   : > { %s431_s28 = scalar_lea.sflag (!%p3406_p11), [#allocation4], %s3208_s29  ;;  %s434_s11 = scalar_lea.vmem (!%p3406_p11), [#allocation3], %s2086_s8 }
  0xc6   : > { %2827 = dma.done.wait (%p3139_p6), %s431_s28, 128  }
  0xc7   : > { %2829 = vsyncadd (%p3139_p6), %s431_s28, 4294967168  ;;  %p3407_p7 = scmp.ne.s32.totalorder %s3390_s24, 0 }
  0xc9   : > { %2831 = dma.done.wait (%p3407_p7), [#allocation7], 1152  }
  0xca   : > { %2833 = vsyncadd (%p3407_p7), [#allocation7], 4294966144 }
  0xcb   : > { %2835 = dma.done.wait (%p3407_p7), [#allocation10], 10240  }
  0xcc   : > { %2837 = vsyncadd (%p3407_p7), [#allocation10], 4294957056 }
  0xcd   : > { %2839 = dma.done.wait (%p3407_p7), [#allocation13], 4096  }
  0xce   : > { %2841 = vsyncadd (%p3407_p7), [#allocation13], 4294963200  ;;  %v2440_v0 = vld [vmem:[%s434_s11] sm:$0xff]   ;;  %v2441_v1 = vld [vmem:[#allocation6] sm:$0xff]   ;;  %vm539_vm0 = vcmask 130048   ;;  %v2882_v14 = vmov 0   ;;  %v625_v27 = vlaneseq }
  0xcf   : > { %517 = vxpose.xlu0.c.b16.start.end [1/1] (short) (narrow) %v2440_v0, 64  ;;  %v2442_v2 = vld [vmem:[#allocation8] sm:$0xff]   ;;  %2285 = vmatprep.subr.bf16.mxu0 %v2441_v1  ;;  %v2443_v3 = vld [vmem:[#allocation8 + $0x8] sm:$0xff]   ;;  %v2444_v4 = vld [vmem:[#allocation8 + $0x10] sm:$0xff]   ;;  %vm497_vm1 = vcmask 1040384   ;;  %vm500_vm3 = vcmask 1041409  }
  0xd0   : > { %2286 = vmatpush3.bf16.msra.mxu0 %v2441_v1  ;;  %2295 = vmatprep.subr.bf16.mxu1 %v2442_v2  ;;  %v2445_v5 = vld [vmem:[#allocation8 + $0x18] sm:$0xff]   ;;  %v2446_v6 = vld [vmem:[#allocation8 + $0x20] sm:$0xff]   ;;  %v2447_v7 = vld [vmem:[#allocation8 + $0x28] sm:$0xff]   ;;  %v3229_v28 = vshrl.u32 %v625_v27, 7  ;;  %vm498_vm2 = vsmask.f32 256 }
  0xd1   : > { %2296 = vmatpush3.bf16.msra.mxu1 %v2442_v2  ;;  %v2448_v12 = vld [vmem:[#allocation8 + $0x30] sm:$0xff]   ;;  %v2449_v13 = vld [vmem:[#allocation8 + $0x38] sm:$0xff]   ;;  %v2450_v15 = vld [vmem:[#allocation9] ss:$8 sps:$4 sm:$0xff]   ;;  %vm501_vm4 = vsmask.f32 1280 }
  0xd2   : > { %2297 = vmatprep.subr.bf16.mxu1 %v2443_v3  ;;  %v2452_v16 = vld [vmem:[#allocation9 + $0x4] ss:$8 sps:$4 sm:$0xff]   ;;  %v2455_v17 = vld [vmem:[#allocation9 + $0x14] ss:$8 sps:$4 sm:$0xff]   ;;  %v2453_v18 = vld [vmem:[#allocation9 + $0x10] ss:$8 sps:$4 sm:$0xff]  }
  0xd3   : > { %882 = vmatprep.subr.bf16.mxu0 %v2452_v16  ;;  %v2458_v19 = vld [vmem:[#allocation9 + $0x24] ss:$8 sps:$4 sm:$0xff]   ;;  %v2456_v20 = vld [vmem:[#allocation9 + $0x20] ss:$8 sps:$4 sm:$0xff]   ;;  %v2461_v21 = vld [vmem:[#allocation9 + $0x34] ss:$8 sps:$4 sm:$0xff]  }
  0xd4   : > { %v2459_v22 = vld [vmem:[#allocation9 + $0x30] ss:$8 sps:$4 sm:$0xff]   ;;  %v2464_v23 = vld [vmem:[#allocation9 + $0x44] ss:$8 sps:$4 sm:$0xff]   ;;  %v2462_v24 = vld [vmem:[#allocation9 + $0x40] ss:$8 sps:$4 sm:$0xff]  }
  0xd5   : > { %2298 = vmatpush3.bf16.msra.mxu1 %v2443_v3  ;;  %v2467_v25 = vld [vmem:[#allocation9 + $0x54] ss:$8 sps:$4 sm:$0xff]   ;;  %v2465_v26 = vld [vmem:[#allocation9 + $0x50] ss:$8 sps:$4 sm:$0xff]   ;;  %v621_v29 = vld [vmem:[%s3363_s2] sm:$0x1] }
  0xd6   : > { %2299 = vmatprep.subr.bf16.mxu1 %v2444_v4  ;;  %v623_v30 = vpack.i.b16 %v621_v29, %v621_v29  ;;  %v3235_v31 = vsub.s32 0, %v3229_v28  ;;  %v2470_v53 = vld [vmem:[#allocation9 + $0x64] ss:$8 sps:$4 sm:$0xff]   ;;  %v2468_v54 = vld [vmem:[#allocation9 + $0x60] ss:$8 sps:$4 sm:$0xff]   ;;  %vm3253_vm5 = vmand %vm497_vm1, %vm498_vm2  ;;  %s3412_s14 = sld [smem:[#allocation24_spill]] }
  0xd7   : > { %v2473_v55 = vld [vmem:[#allocation9 + $0x74] ss:$8 sps:$4 sm:$0xff]   ;;  %v2471_v56 = vld [vmem:[#allocation9 + $0x70] ss:$8 sps:$4 sm:$0xff]   ;;  %v770_v57 = vld [vmem:[%s3365_s4] sm:$0x1] }
  0xd8   : > { %v628_v34 = vrot.slane %v623_v30, %v3235_v31  ;;  %v772_v58 = vpack.i.b16 %v770_v57, %v770_v57  ;;  %v2486_v27 = vld [vmem:[#allocation11 + $0x40] ss:$16 sps:$4 sm:$0xff]   ;;  %v2489_v29 = vld [vmem:[#allocation11 + $0x48] ss:$16 sps:$4 sm:$0xff]   ;;  %v2494_v30 = vld [vmem:[#allocation11 + $0x64] ss:$16 sps:$4 sm:$0xff]  }
  0xd9   : > { %2300 = vmatpush3.bf16.msra.mxu1 %v2444_v4  ;;  %v2528_v57 = vld [vmem:[#allocation11 + $0x120] ss:$16 sps:$4 sm:$0xff]   ;;  %vm3257_vm6 = vmand %vm500_vm3, %vm501_vm4  ;;  %s3413_s30 = sld [smem:[#allocation20_spill]]  ;;  %s3414_s8 = sld [smem:[#allocation25_spill]] }
  0xda   : > { %2301 = vmatprep.subr.bf16.mxu1 %v2445_v5  ;;  %v777_v62 = vrot.slane %v772_v58, %v3235_v31  ;;  %v2531_v58 = vld [vmem:[#allocation11 + $0x128] ss:$16 sps:$4 sm:$0xff]   ;;  %vm503_vm7 = vmor %vm3257_vm6, %vm3253_vm5  ;;  %s491_s11 = scalar_lea.vmem [#allocation14], %s3208_s29  ;;  %s3415_s23 = sld [smem:[#allocation26_spill]] }
  0xdb   : > { %s1949_s24 = sshll.u32 %s491_s11, 4  ;;  %s1937_s5 = scalar_lea.sflag [#allocation5], %s3208_s29  ;;  %s3314_s24 = int_to_ptr.vmem [resolvable:$true] %s1949_s24 }
  0xdc   : > { %s2774_s20 = scalar_lea.vmem %s3314_s24, 16  ;;  %p3416_p5 = scmp.ne.s32.totalorder %s3403_s16, 0 }
  0xdd   : > { %2302 = vmatpush3.bf16.msra.mxu1 %v2445_v5  ;;  %p2775_p6 = scmp.ne.s32.totalorder %s3314_s24, %s2774_s20  ;;  %s2884_s10 = smov [#allocation14]  }
  0xde   : > { %2303 = vmatprep.subr.bf16.mxu1 %v2446_v6 }
  0xdf   : > { %s2220_s28 = sshll.u32 %s3413_s30, 4  ;;  %p2776_p10 = pnand %p2775_p6, %p3416_p5 }
  0xe0   : > { %s3312_s13 = scalar_lea.hbm %s3415_s23, %s2220_s28 }
  0xe1   : > { %2304 = vmatpush3.bf16.msra.mxu1 %v2446_v6  ;;  %p2777_p3 = pneg %p2776_p10 }
  0xe2   : > { %2305 = vmatprep.subr.bf16.mxu1 %v2447_v7 }
  0xe5   : > { %2306 = vmatpush3.bf16.msra.mxu1 %v2447_v7 }
  0xe6   : > { %2307 = vmatprep.subr.bf16.mxu1 %v2448_v12 }
  0xe9   : > { %2308 = vmatpush3.bf16.msra.mxu1 %v2448_v12 }
  0xea   : > { %2309 = vmatprep.subr.bf16.mxu1 %v2449_v13 }
  0xed   : > { %2310 = vmatpush3.bf16.msra.mxu1 %v2449_v13 }
 0x135   : > { %v525_v8 = vpop.trf.xlu0 }
 0x136   : > { %2287 = vmatprep.mubr.msk.bf16.mxu0 %vm539_vm0, %v525_v8 }
 0x139   : > { %v526_v9 = vpop.trf.xlu0 }
 0x13a   : > { %2288 = vmatmul.mubr.msk.bf16.vlgmr.msra.gmra.mrb[0].mxu0 %vm539_vm0, %v526_v9 }
 0x13b   : > { %883 = vmatpush1.bf16.msra.mxu0 %v2450_v15 }
 0x13c   : > { %884 = vmatprep.subr.bf16.mxu0 %v2455_v17  ;;  %v2476_v17 = vld [vmem:[#allocation11 + $0x4] ss:$16 sps:$4 sm:$0xff]  }
 0x13d   : > { %v527_v10 = vpop.trf.xlu0  ;;  %1507 = vmatprep.subr.bf16.mxu1 %v2476_v17  ;;  %v2563_v17 = vld [vmem:[#allocation11 + $0x1cc] ss:$16 sps:$4 sm:$0xff]  }
 0x13e   : > { %2291 = vmatprep.mubr.msk.bf16.mxu0 %vm539_vm0, %v527_v10 }
 0x13f   : > { %885 = vmatpush1.bf16.msra.mxu0 %v2453_v18  ;;  %v2479_v18 = vld [vmem:[#allocation11 + $0xc] ss:$16 sps:$4 sm:$0xff]  }
 0x140   : > { %886 = vmatprep.subr.bf16.mxu0 %v2458_v19  ;;  %v2474_v19 = vld [vmem:[#allocation11] ss:$16 sps:$4 sm:$0xff]  }
 0x141   : > { %v528_v11 = vpop.trf.xlu0 }
 0x142   : > { %2292 = vmatmul.mubr.msk.bf16.gmra.mrb[4].mxu0 %vm539_vm0, %v528_v11 }
 0x143   : > { %914 = vmatprep.mubr.bf16.mxu0 %v2882_v14  ;;  %887 = vmatpush1.bf16.msra.mxu0 %v2456_v20  ;;  %v2477_v20 = vld [vmem:[#allocation11 + $0x8] ss:$16 sps:$4 sm:$0xff]  }
 0x144   : > { %888 = vmatprep.subr.bf16.mxu0 %v2461_v21  ;;  %v2482_v21 = vld [vmem:[#allocation11 + $0x24] ss:$16 sps:$4 sm:$0xff]  }
 0x147   : > { %889 = vmatpush1.bf16.msra.mxu0 %v2459_v22  ;;  %v2485_v22 = vld [vmem:[#allocation11 + $0x2c] ss:$16 sps:$4 sm:$0xff]  }
 0x148   : > { %890 = vmatprep.subr.bf16.mxu0 %v2464_v23  ;;  %v2480_v23 = vld [vmem:[#allocation11 + $0x20] ss:$16 sps:$4 sm:$0xff]  }
 0x14b   : > { %891 = vmatpush1.bf16.msra.mxu0 %v2462_v24  ;;  %v2483_v24 = vld [vmem:[#allocation11 + $0x28] ss:$16 sps:$4 sm:$0xff]  }
 0x14c   : > { %892 = vmatprep.subr.bf16.mxu0 %v2467_v25  ;;  %v2488_v25 = vld [vmem:[#allocation11 + $0x44] ss:$16 sps:$4 sm:$0xff]  }
 0x14f   : > { %893 = vmatpush1.bf16.msra.mxu0 %v2465_v26  ;;  %v2491_v26 = vld [vmem:[#allocation11 + $0x4c] ss:$16 sps:$4 sm:$0xff]  }
 0x150   : > { %894 = vmatprep.subr.bf16.mxu0 %v2470_v53  ;;  %v2522_v53 = vld [vmem:[#allocation11 + $0x100] ss:$16 sps:$4 sm:$0xff]  }
 0x153   : > { %895 = vmatpush1.bf16.msra.mxu0 %v2468_v54  ;;  %v2525_v54 = vld [vmem:[#allocation11 + $0x108] ss:$16 sps:$4 sm:$0xff]  }
 0x154   : > { %896 = vmatprep.subr.bf16.mxu0 %v2473_v55  ;;  %v2530_v55 = vld [vmem:[#allocation11 + $0x124] ss:$16 sps:$4 sm:$0xff]  }
 0x157   : > { %897 = vmatpush1.bf16.msra.mxu0 %v2471_v56  ;;  %v2533_v56 = vld [vmem:[#allocation11 + $0x12c] ss:$16 sps:$4 sm:$0xff]  }
 0x158   : > { %1548 = vmatprep.subr.bf16.mxu0 %v2479_v18  ;;  %v2558_v18 = vld [vmem:[#allocation11 + $0x1c0] ss:$16 sps:$4 sm:$0xff]  }
 0x20d   : > { %v2289_v32 = vpop.f32.mrb[0].mxu0 }
 0x20e   : > { %v586_v33 = vpop.f32.mrb[1].mxu0 }
 0x20f   : > { %v2290_v35 = vpop.f32.mrb[2].mxu0 }
 0x210   : > { %v618_v36 = vpack.c.bf16 %v2290_v35, %v2289_v32  ;;  %v589_v37 = vpop.f32.mrb[3].mxu0  ;;  %v2497_v32 = vld [vmem:[#allocation11 + $0x6c] ss:$16 sps:$4 sm:$0xff]   ;;  %v2500_v35 = vld [vmem:[#allocation11 + $0x84] ss:$16 sps:$4 sm:$0xff]  }
 0x211   : > { %v617_v38 = vpack.c.bf16 %v589_v37, %v586_v33  ;;  %v2492_v33 = vld [vmem:[#allocation11 + $0x60] ss:$16 sps:$4 sm:$0xff]  }
 0x212   : > { %v630_v39 = vadd.bf16 %v628_v34, %v618_v36  ;;  %v2503_v36 = vld [vmem:[#allocation11 + $0x8c] ss:$16 sps:$4 sm:$0xff]   ;;  %v2498_v37 = vld [vmem:[#allocation11 + $0x80] ss:$16 sps:$4 sm:$0xff]  }
 0x213   : > { %v629_v40 = vadd.bf16 %v628_v34, %v617_v38  ;;  %v2501_v38 = vld [vmem:[#allocation11 + $0x88] ss:$16 sps:$4 sm:$0xff]  }
 0x214   : > { %v634_v44 = vmax.bf16 %v2882_v14, %v630_v39  ;;  %v2506_v39 = vld [vmem:[#allocation11 + $0xa4] ss:$16 sps:$4 sm:$0xff]  }
 0x215   : > { %v2293_v41 = vpop.f32.mrb[4].mxu0  ;;  %v633_v42 = vmax.bf16 %v2882_v14, %v629_v40  ;;  %v2509_v40 = vld [vmem:[#allocation11 + $0xac] ss:$16 sps:$4 sm:$0xff]  }
 0x216   : > { %v602_v43 = vpop.f32.mrb[5].mxu0 }
 0x217   : > { %2311 = vmatprep.mubr.bf16.mxu1 %v633_v42  ;;  %v2294_v45 = vpop.f32.mrb[6].mxu0  ;;  %v2507_v42 = vld [vmem:[#allocation11 + $0xa8] ss:$16 sps:$4 sm:$0xff]  }
 0x218   : > { %v620_v46 = vpack.c.bf16 %v2294_v45, %v2293_v41  ;;  %2312 = vmatmul.mubr.bf16.vlgmr.msra.gmra.mrb[0].mxu1 %v634_v44  ;;  %v605_v47 = vpop.f32.mrb[7].mxu0  ;;  %v2504_v41 = vld [vmem:[#allocation11 + $0xa0] ss:$16 sps:$4 sm:$0xff]   ;;  %v2515_v44 = vld [vmem:[#allocation11 + $0xcc] ss:$16 sps:$4 sm:$0xff]  }
 0x219   : > { %v619_v48 = vpack.c.bf16 %v605_v47, %v602_v43  ;;  %1508 = vmatpush1.bf16.msra.mxu1 %v2474_v19  ;;  %v2512_v43 = vld [vmem:[#allocation11 + $0xc4] ss:$16 sps:$4 sm:$0xff]   ;;  %v2510_v45 = vld [vmem:[#allocation11 + $0xc0] ss:$16 sps:$4 sm:$0xff]  }
 0x21a   : > { %v632_v49 = vadd.bf16 %v628_v34, %v620_v46  ;;  %1509 = vmatprep.subr.bf16.mxu1 %v2482_v21  ;;  %v2513_v46 = vld [vmem:[#allocation11 + $0xc8] ss:$16 sps:$4 sm:$0xff]   ;;  %v2518_v47 = vld [vmem:[#allocation11 + $0xe4] ss:$16 sps:$4 sm:$0xff]   ;;  %v2569_v21 = vld [vmem:[#allocation11 + $0x1ec] ss:$16 sps:$4 sm:$0xff]  }
 0x21b   : > { %v631_v50 = vadd.bf16 %v628_v34, %v619_v48  ;;  %v2495_v34 = vld [vmem:[#allocation11 + $0x68] ss:$16 sps:$4 sm:$0xff]   ;;  %v2521_v48 = vld [vmem:[#allocation11 + $0xec] ss:$16 sps:$4 sm:$0xff]   ;;  %v2566_v19 = vld [vmem:[#allocation11 + $0x1e4] ss:$16 sps:$4 sm:$0xff]  }
 0x21c   : > { %v636_v51 = vmax.bf16 %v2882_v14, %v632_v49  ;;  %v2516_v49 = vld [vmem:[#allocation11 + $0xe0] ss:$16 sps:$4 sm:$0xff]  }
 0x21d   : > { %v635_v52 = vmax.bf16 %v2882_v14, %v631_v50  ;;  %1510 = vmatpush1.bf16.msra.mxu1 %v2480_v23  ;;  %v2519_v50 = vld [vmem:[#allocation11 + $0xe8] ss:$16 sps:$4 sm:$0xff]  }
 0x21e   : > { %1511 = vmatprep.subr.bf16.mxu1 %v2488_v25  ;;  %v2567_v23 = vld [vmem:[#allocation11 + $0x1e8] ss:$16 sps:$4 sm:$0xff]   ;;  %v2571_v25 = vld [vmem:[#allocation12 + $0xc0] sm:$0xff]  }
 0x21f   : > { %2315 = vmatprep.mubr.bf16.mxu1 %v635_v52  ;;  %v2527_v52 = vld [vmem:[#allocation11 + $0x10c] ss:$16 sps:$4 sm:$0xff]  }
 0x220   : > { %2316 = vmatmul.mubr.bf16.gmra.mrb[4].mxu1 %v636_v51  ;;  %v2524_v51 = vld [vmem:[#allocation11 + $0x104] ss:$16 sps:$4 sm:$0xff]  }
 0x221   : > { %1512 = vmatpush1.bf16.msra.mxu1 %v2486_v27 }
 0x222   : > { %1513 = vmatprep.subr.bf16.mxu1 %v2494_v30 }
 0x225   : > { %1514 = vmatpush1.bf16.msra.mxu1 %v2492_v33  ;;  %v2122_v33 = vld.sshfl [vmem:[%s3367_s6] sm:$0x11 pattern:$0x75316420] }
 0x226   : > { %1515 = vmatprep.subr.bf16.mxu1 %v2500_v35 }
 0x229   : > { %1516 = vmatpush1.bf16.msra.mxu1 %v2498_v37 }
 0x22a   : > { %1517 = vmatprep.subr.bf16.mxu1 %v2506_v39  ;;  %v972_v39 = vcombine.high %v2122_v33, %v2122_v33 }
 0x22d   : > { %1518 = vmatpush1.bf16.msra.mxu1 %v2504_v41 }
 0x22e   : > { %1519 = vmatprep.subr.bf16.mxu1 %v2512_v43 }
 0x231   : > { %1520 = vmatpush1.bf16.msra.mxu1 %v2510_v45 }
 0x232   : > { %1521 = vmatprep.subr.bf16.mxu1 %v2518_v47 }
 0x235   : > { %1522 = vmatpush1.bf16.msra.mxu1 %v2516_v49 }
 0x236   : > { %1523 = vmatprep.subr.bf16.mxu1 %v2524_v51 }
 0x239   : > { %1524 = vmatpush1.bf16.msra.mxu1 %v2522_v53 }
 0x23a   : > { %1525 = vmatprep.subr.bf16.mxu1 %v2530_v55 }
 0x23d   : > { %1526 = vmatpush1.bf16.msra.mxu1 %v2528_v57 }
 0x2eb   : > { %v2313_v59 = vpop.f32.mrb[0].mxu1 }
 0x2ec   : > { %v735_v60 = vpop.f32.mrb[1].mxu1 }
 0x2ed   : > { %v2314_v61 = vpop.f32.mrb[2].mxu1 }
 0x2ee   : > { %v767_v63 = vpack.c.bf16 %v2314_v61, %v2313_v59  ;;  %v738_v0 = vpop.f32.mrb[3].mxu1  ;;  %v504_v61 = vld [vmem:[#allocation2] sm:$0x3]  ;;  %v2576_v59 = vld [vmem:[#allocation12 + $0x8] sm:$0xff]  }
 0x2ef   : > { %v766_v1 = vpack.c.bf16 %v738_v0, %v735_v60  ;;  %v2537_v0 = vld [vmem:[#allocation11 + $0x148] ss:$16 sps:$4 sm:$0xff]  }
 0x2f0   : > { %v779_v9 = vadd.bf16 %v777_v62, %v767_v63  ;;  %v2534_v63 = vld [vmem:[#allocation11 + $0x140] ss:$16 sps:$4 sm:$0xff]   ;;  %v2577_v60 = vld [vmem:[#allocation12 + $0x88] sm:$0xff]  }
 0x2f1   : > { %v778_v2 = vadd.bf16 %v777_v62, %v766_v1  ;;  %v505_v1 = vsel %vm503_vm7, 0, %v504_v61 }
 0x2f2   : > { %v783_v11 = vmax.bf16 %v2882_v14, %v779_v9  ;;  %506 = vst [vmem:[#allocation2] sm:$0x3] %v505_v1  ;;  %v2546_v9 = vld [vmem:[#allocation11 + $0x180] ss:$16 sps:$4 sm:$0xff]  }
 0x2f3   : > { %v782_v3 = vmax.bf16 %v2882_v14, %v778_v2  ;;  %v2317_v4 = vpop.f32.mrb[4].mxu1  ;;  %v2539_v2 = vld [vmem:[#allocation11 + $0x14c] ss:$16 sps:$4 sm:$0xff]  }
 0x2f4   : > { %v751_v5 = vpop.f32.mrb[5].mxu1 }
 0x2f5   : > { %915 = vmatmul.mubr.bf16.vlgmr.msra.gmra.mrb[8].mxu0 %v782_v3  ;;  %v2318_v6 = vpop.f32.mrb[6].mxu1  ;;  %v2542_v3 = vld [vmem:[#allocation11 + $0x164] ss:$16 sps:$4 sm:$0xff]  }
 0x2f6   : > { %v769_v7 = vpack.c.bf16 %v2318_v6, %v2317_v4  ;;  %v754_v8 = vpop.f32.mrb[7].mxu1  ;;  %924 = vmatprep.mubr.bf16.mxu0 %v2882_v14  ;;  %1549 = vmatpush1.bf16.msra.mxu0 %v2477_v20  ;;  %v2545_v4 = vld [vmem:[#allocation11 + $0x16c] ss:$16 sps:$4 sm:$0xff]   ;;  %v2543_v6 = vld [vmem:[#allocation11 + $0x168] ss:$16 sps:$4 sm:$0xff]  }
 0x2f7   : > { %v768_v10 = vpack.c.bf16 %v754_v8, %v751_v5  ;;  %1550 = vmatprep.subr.bf16.mxu0 %v2485_v22  ;;  %v2540_v5 = vld [vmem:[#allocation11 + $0x160] ss:$16 sps:$4 sm:$0xff]   ;;  %v2551_v8 = vld [vmem:[#allocation11 + $0x18c] ss:$16 sps:$4 sm:$0xff]   ;;  %v2561_v20 = vld [vmem:[#allocation11 + $0x1c8] ss:$16 sps:$4 sm:$0xff]  }
 0x2f8   : > { %v781_v15 = vadd.bf16 %v777_v62, %v769_v7  ;;  %v2548_v7 = vld [vmem:[#allocation11 + $0x184] ss:$16 sps:$4 sm:$0xff]   ;;  %v2564_v22 = vld [vmem:[#allocation11 + $0x1e0] ss:$16 sps:$4 sm:$0xff]  }
 0x2f9   : > { %v780_v12 = vadd.bf16 %v777_v62, %v768_v10  ;;  %v2536_v62 = vld [vmem:[#allocation11 + $0x144] ss:$16 sps:$4 sm:$0xff]   ;;  %v2549_v10 = vld [vmem:[#allocation11 + $0x188] ss:$16 sps:$4 sm:$0xff]  }
 0x2fa   : > { %v785_v16 = vmax.bf16 %v2882_v14, %v781_v15  ;;  %1551 = vmatpush1.bf16.msra.mxu0 %v2483_v24  ;;  %1527 = vmatprep.subr.bf16.mxu1 %v2536_v62  ;;  %v2555_v15 = vld [vmem:[#allocation11 + $0x1a8] ss:$16 sps:$4 sm:$0xff]   ;;  %v2570_v24 = vld [vmem:[#allocation12 + $0x40] sm:$0xff]  }
 0x2fb   : > { %v784_v13 = vmax.bf16 %v2882_v14, %v780_v12  ;;  %1552 = vmatprep.subr.bf16.mxu0 %v2491_v26  ;;  %1528 = vmatpush1.bf16.msra.mxu1 %v2534_v63  ;;  %v2557_v12 = vld [vmem:[#allocation11 + $0x1ac] ss:$16 sps:$4 sm:$0xff]   ;;  %v2883_v26 = vmov 1966171168  }
 0x2fc   : > { %1529 = vmatprep.subr.bf16.mxu1 %v2542_v3  ;;  %v974_v27 = vunpack.c.l.s4 %v2883_v26 }
 0x2fd   : > { %925 = vmatmul.mubr.bf16.gmra.mrb[12].mxu0 %v783_v11  ;;  %v2554_v11 = vld [vmem:[#allocation11 + $0x1a4] ss:$16 sps:$4 sm:$0xff]  }
 0x2fe   : > { %934 = vmatprep.mubr.bf16.mxu0 %v2882_v14  ;;  %1553 = vmatpush1.bf16.msra.mxu0 %v2489_v29  ;;  %v975_v29 = vunpack.c.0.s8 %v974_v27 }
 0x2ff   : > { %1554 = vmatprep.subr.bf16.mxu0 %v2497_v32  ;;  %1530 = vmatpush1.bf16.msra.mxu1 %v2540_v5 }
 0x300   : > { %1531 = vmatprep.subr.bf16.mxu1 %v2548_v7 }
 0x302   : > { %1555 = vmatpush1.bf16.msra.mxu0 %v2495_v34 }
 0x303   : > { %1556 = vmatprep.subr.bf16.mxu0 %v2503_v36  ;;  %1532 = vmatpush1.bf16.msra.mxu1 %v2546_v9  ;;  %v3274_v36 = vsub.s32 %v975_v29, %v3229_v28 }
 0x304   : > { %1533 = vmatprep.subr.bf16.mxu1 %v2554_v11 }
 0x305   : > { %935 = vmatmul.mubr.bf16.gmra.mrb[16].mxu0 %v784_v13  ;;  %v2552_v13 = vld [vmem:[#allocation11 + $0x1a0] ss:$16 sps:$4 sm:$0xff]   ;;  %v986_v41 = vrot.slane %v972_v39, %v3274_v36 }
 0x306   : > { %944 = vmatprep.mubr.bf16.mxu0 %v2882_v14  ;;  %1557 = vmatpush1.bf16.msra.mxu0 %v2501_v38 }
 0x307   : > { %1558 = vmatprep.subr.bf16.mxu0 %v2509_v40  ;;  %1534 = vmatpush1.bf16.msra.mxu1 %v2552_v13  ;;  %v979_v40 = vrot.slane %v2122_v33, %v3274_v36 }
 0x309   : > { %v988_v45 = vpack.i.b16 %v979_v40, %v979_v40 }
 0x30a   : > { %1559 = vmatpush1.bf16.msra.mxu0 %v2507_v42 }
 0x30b   : > { %1560 = vmatprep.subr.bf16.mxu0 %v2515_v44 }
 0x30d   : > { %945 = vmatmul.mubr.bf16.gmra.mrb[20].mxu0 %v785_v16  ;;  %v2560_v16 = vld [vmem:[#allocation11 + $0x1c4] ss:$16 sps:$4 sm:$0xff]  }
 0x30e   : > { %1561 = vmatpush1.bf16.msra.mxu0 %v2513_v46  ;;  %1535 = vmatprep.subr.bf16.mxu1 %v2560_v16 }
 0x30f   : > { %1562 = vmatprep.subr.bf16.mxu0 %v2521_v48  ;;  %1536 = vmatpush1.bf16.msra.mxu1 %v2558_v18  ;;  %v995_v48 = vpack.i.b16 %v986_v41, %v986_v41 }
 0x310   : > { %1537 = vmatprep.subr.bf16.mxu1 %v2566_v19 }
 0x311   : > { %v1000_v51 = vrot.slane %v995_v48, %v3235_v31 }
 0x312   : > { %1563 = vmatpush1.bf16.msra.mxu0 %v2519_v50  ;;  %v993_v50 = vrot.slane %v988_v45, %v3235_v31 }
 0x313   : > { %1564 = vmatprep.subr.bf16.mxu0 %v2527_v52  ;;  %1538 = vmatpush1.bf16.msra.mxu1 %v2564_v22 }
 0x314   : > { %2241 = vmatprep.subr.bf16.mxu1 %v2570_v24 }
 0x316   : > { %1565 = vmatpush1.bf16.msra.mxu0 %v2525_v54 }
 0x317   : > { %1566 = vmatprep.subr.bf16.mxu0 %v2533_v56 }
 0x31a   : > { %1567 = vmatpush1.bf16.msra.mxu0 %v2531_v58 }
 0x31b   : > { %1568 = vmatprep.subr.bf16.mxu0 %v2539_v2 }
 0x31e   : > { %1569 = vmatpush1.bf16.msra.mxu0 %v2537_v0 }
 0x31f   : > { %1570 = vmatprep.subr.bf16.mxu0 %v2545_v4 }
 0x322   : > { %1571 = vmatpush1.bf16.msra.mxu0 %v2543_v6 }
 0x323   : > { %1572 = vmatprep.subr.bf16.mxu0 %v2551_v8 }
 0x326   : > { %1573 = vmatpush1.bf16.msra.mxu0 %v2549_v10 }
 0x327   : > { %1574 = vmatprep.subr.bf16.mxu0 %v2557_v12 }
 0x32a   : > { %1575 = vmatpush1.bf16.msra.mxu0 %v2555_v15 }
 0x32b   : > { %1576 = vmatprep.subr.bf16.mxu0 %v2563_v17 }
 0x32e   : > { %1577 = vmatpush1.bf16.msra.mxu0 %v2561_v20 }
 0x32f   : > { %1578 = vmatprep.subr.bf16.mxu0 %v2569_v21 }
 0x332   : > { %1579 = vmatpush1.bf16.msra.mxu0 %v2567_v23 }
 0x333   : > { %2263 = vmatprep.subr.bf16.mxu0 %v2571_v25 }
 0x3c8   : > { %v916_v30 = vpop.f32.mrb[8].mxu0 }
 0x3c9   : > { %v918_v32 = vpop.f32.mrb[9].mxu0 }
 0x3ca   : > { %v920_v34 = vpop.f32.mrb[10].mxu0 }
 0x3cb   : > { %v955_v35 = vpack.c.bf16 %v920_v34, %v916_v30  ;;  %v922_v37 = vpop.f32.mrb[11].mxu0 }
 0x3cc   : > { %v956_v38 = vpack.c.bf16 %v922_v37, %v918_v32 }
 0x3cd   : > { %v1001_v55 = vadd.bf16 %v993_v50, %v955_v35 }
 0x3ce   : > { %v1002_v58 = vadd.bf16 %v1000_v51, %v956_v38 }
 0x3cf   : > { %v1009_v0 = vmax.bf16 %v2882_v14, %v1001_v55 }
 0x3d0   : > { %v926_v42 = vpop.f32.mrb[12].mxu0  ;;  %v1010_v2 = vmax.bf16 %v2882_v14, %v1002_v58 }
 0x3d1   : > { %v928_v43 = vpop.f32.mrb[13].mxu0 }
 0x3d2   : > { %v930_v44 = vpop.f32.mrb[14].mxu0 }
 0x3d3   : > { %v957_v46 = vpack.c.bf16 %v930_v44, %v926_v42  ;;  %v932_v47 = vpop.f32.mrb[15].mxu0 }
 0x3d4   : > { %v958_v49 = vpack.c.bf16 %v932_v47, %v928_v43 }
 0x3d5   : > { %v1003_v9 = vadd.bf16 %v993_v50, %v957_v46 }
 0x3d6   : > { %v1004_v12 = vadd.bf16 %v1000_v51, %v958_v49  ;;  %v1043_v49 = vld [vmem:[#allocation2] sm:$0x3] }
 0x3d7   : > { %v1011_v17 = vmax.bf16 %v2882_v14, %v1003_v9  ;;  %v2589_v9 = vld [vmem:[#allocation12 + $0xa0] sm:$0xff]  }
 0x3d8   : > { %v936_v52 = vpop.f32.mrb[16].mxu0  ;;  %v1012_v19 = vmax.bf16 %v2882_v14, %v1004_v12  ;;  %v2592_v12 = vld [vmem:[#allocation12 + $0x28] sm:$0xff]  }
 0x3d9   : > { %v938_v53 = vpop.f32.mrb[17].mxu0 }
 0x3da   : > { %v940_v54 = vpop.f32.mrb[18].mxu0 }
 0x3db   : > { %v959_v56 = vpack.c.bf16 %v940_v54, %v936_v52  ;;  %v942_v57 = vpop.f32.mrb[19].mxu0 }
 0x3dc   : > { %v960_v61 = vpack.c.bf16 %v942_v57, %v938_v53  ;;  %v2573_v57 = vld [vmem:[#allocation12 + $0x80] sm:$0xff]  }
 0x3dd   : > { %v1005_v62 = vadd.bf16 %v993_v50, %v959_v56  ;;  %v2572_v56 = vld [vmem:[#allocation12] sm:$0xff]  }
 0x3de   : > { %v1006_v63 = vadd.bf16 %v1000_v51, %v960_v61  ;;  %v2574_v61 = vld [vmem:[#allocation12 + $0x48] sm:$0xff]  }
 0x3df   : > { %v1013_v1 = vmax.bf16 %v2882_v14, %v1005_v62  ;;  %v2575_v62 = vld [vmem:[#allocation12 + $0xc8] sm:$0xff]  }
 0x3e0   : > { %v1014_v3 = vmax.bf16 %v2882_v14, %v1006_v63  ;;  %v946_v4 = vpop.f32.mrb[20].mxu0  ;;  %v2578_v63 = vld [vmem:[#allocation12 + $0x50] sm:$0xff]  }
 0x3e1   : > { %v1017_v5 = vmax.bf16 %v1013_v1, %v1009_v0  ;;  %v948_v6 = vpop.f32.mrb[21].mxu0  ;;  %v2579_v0 = vld [vmem:[#allocation12 + $0xd0] sm:$0xff]  }
 0x3e2   : > { %v1030_v7 = vmax.bf16 %v1014_v3, %v1010_v2  ;;  %v950_v8 = vpop.f32.mrb[22].mxu0  ;;  %v2580_v1 = vld [vmem:[#allocation12 + $0x10] sm:$0xff]   ;;  %v2583_v3 = vld [vmem:[#allocation12 + $0xd8] sm:$0xff]  }
 0x3e3   : > { %v961_v10 = vpack.c.bf16 %v950_v8, %v946_v4  ;;  %v952_v11 = vpop.f32.mrb[23].mxu0  ;;  %v2581_v2 = vld [vmem:[#allocation12 + $0x90] sm:$0xff]   ;;  %v2584_v4 = vld [vmem:[#allocation12 + $0x18] sm:$0xff]   ;;  %v2588_v8 = vld [vmem:[#allocation12 + $0x20] sm:$0xff]  }
 0x3e4   : > { %v962_v13 = vpack.c.bf16 %v952_v11, %v948_v6  ;;  %v2586_v6 = vld [vmem:[#allocation12 + $0x60] sm:$0xff]   ;;  %v2591_v11 = vld [vmem:[#allocation12 + $0xe8] sm:$0xff]  }
 0x3e5   : > { %v1007_v15 = vadd.bf16 %v993_v50, %v961_v10  ;;  %v2590_v10 = vld [vmem:[#allocation12 + $0x68] sm:$0xff]  }
 0x3e6   : > { %v1008_v16 = vadd.bf16 %v1000_v51, %v962_v13  ;;  %v2593_v13 = vld [vmem:[#allocation12 + $0xa8] sm:$0xff]  }
 0x3e7   : > { %v1015_v18 = vmax.bf16 %v2882_v14, %v1007_v15  ;;  %v2594_v15 = vld [vmem:[#allocation12 + $0x70] sm:$0xff]  }
 0x3e8   : > { %v1016_v20 = vmax.bf16 %v2882_v14, %v1008_v16  ;;  %v2595_v16 = vld [vmem:[#allocation12 + $0xf0] sm:$0xff]  }
 0x3e9   : > { %v1018_v21 = vmax.bf16 %v1015_v18, %v1011_v17  ;;  %v2596_v17 = vld [vmem:[#allocation12 + $0x30] sm:$0xff]  }
 0x3ea   : > { %v1031_v22 = vmax.bf16 %v1016_v20, %v1012_v19  ;;  %v2597_v18 = vld [vmem:[#allocation12 + $0xb0] sm:$0xff]   ;;  %v2598_v19 = vld [vmem:[#allocation12 + $0x78] sm:$0xff]  }
 0x3eb   : > { %v1019_v23 = vmax.bf16 %v1018_v21, %v1017_v5  ;;  %v2585_v5 = vld [vmem:[#allocation12 + $0x98] sm:$0xff]  }
 0x3ec   : > { %v1032_v24 = vmax.bf16 %v1031_v22, %v1030_v7  ;;  %v2587_v7 = vld [vmem:[#allocation12 + $0xe0] sm:$0xff]   ;;  %v2599_v20 = vld [vmem:[#allocation12 + $0xf8] sm:$0xff]  }
 0x3ed   : > { %v1020_v25 = vunpack.i.l.bf16 %v1019_v23  ;;  %v1021_v26 = vunpack.i.h.bf16 %v1019_v23  ;;  %v2600_v21 = vld [vmem:[#allocation12 + $0x38] sm:$0xff]   ;;  %v1497_v23 = vsub.s32 2, %v3229_v28 }
 0x3ee   : > { %v1033_v27 = vunpack.i.l.bf16 %v1032_v24  ;;  %v1034_v29 = vunpack.i.h.bf16 %v1032_v24  ;;  %v2601_v22 = vld [vmem:[#allocation12 + $0xb8] sm:$0xff]   ;;  %v1140_v24 = vld [vmem:[%s3412_s14] sm:$0xf]  ;;  %s2778_s14 = sshll.u32 %s2884_s10, 4  ;;  %s2779_s14 = int_to_ptr.vmem [resolvable:$false] %s2778_s14 }
 0x3ef   : > { %v1022_v30 = vmax.f32 %v1020_v25, %v1021_v26  ;;  %v1493_v25 = vsub.s32 1, %v3229_v28  ;;  %v1501_v26 = vsub.s32 3, %v3229_v28  ;;  %s2780_s30 = scalar_lea.vmem %s2779_s14, 32  ;;  %p2781_p2 = scmp.lt.s32.totalorder %s3314_s24, %s2779_s14 }
 0x3f0   : > { %v1035_v32 = vmax.f32 %v1033_v27, %v1034_v29  ;;  %v1490_v27 = vrot.slane %v1140_v24, %v3235_v31  ;;  %v1498_v29 = vrot.slane %v1140_v24, %v1497_v23  ;;  %p2782_p4 = scmp.lt.s32.totalorder %s2780_s30, %s2774_s20 }
 0x3f1   : > { %v1023_v33 = vrot.slane %v1022_v30, 4 }
 0x3f2   : > { %v1036_v34 = vrot.slane %v1035_v32, 4  ;;  %p2783_p9 = por %p2782_p4, %p2781_p2 }
 0x3f3   : > { %v1024_v35 = vmax.f32 %v1022_v30, %v1023_v33  ;;  %v1494_v30 = vrot.slane %v1140_v24, %v1493_v25 }
 0x3f4   : > { %v1037_v37 = vmax.f32 %v1035_v32, %v1036_v34  ;;  %v1502_v32 = vrot.slane %v1140_v24, %v1501_v26  ;;  %p2784_p8 = pnand %p2783_p9, %p2777_p3 }
 0x3f5   : > { %v1025_v38 = vrot.slane %v1024_v35, 2 }
 0x3f6   : > { %v1038_v39 = vrot.slane %v1037_v37, 2 }
 0x3f7   : > { %v1026_v40 = vmax.f32 %v1024_v35, %v1025_v38 }
 0x3f8   : > { %v1039_v41 = vmax.f32 %v1037_v37, %v1038_v39 }
 0x3f9   : > { %v1027_v42 = vrot.slane %v1026_v40, 1 }
 0x3fa   : > { %v1040_v14 = vrot.slane %v1039_v41, 1 }
 0x3fb   : > { %v1028_v43 = vmax.f32 %v1026_v40, %v1027_v42 }
 0x3fc   : > { %v1041_v44 = vmax.f32 %v1039_v41, %v1040_v14 }
 0x3fd   : > { %v1029_v45 = vpack.i.bf16 %v1028_v43, %v1028_v43 }
 0x3fe   : > { %v1042_v46 = vpack.i.bf16 %v1041_v44, %v1041_v44 }
 0x400   : > { %v1046_v47 = vcombine.low %v1029_v45, %v1042_v46 }
 0x402   : > { %v1053_v48 = vrot.slane %v1046_v47, %v3274_v36 }
 0x404   : > { %v1060_v50 = vrot.slane %v1053_v48, %v3274_v36 }
 0x406   : > { %v1062_v51 = vmax.bf16 %v1060_v50, %v1043_v49 }
 0x408   : > { %v1070_v52 = vsel %vm503_vm7, %v1062_v51, %v1043_v49 }
 0x409   : > { %1071 = vst [vmem:[#allocation2] sm:$0x3] %v1070_v52 }
 0x410   : > { %v2123_v53 = vld.sshfl [vmem:[#allocation2] sm:$0x11 pattern:$0x75316420] }
 0x411   : > { %v1149_v54 = vcombine.high %v2123_v53, %v2123_v53  ;;  %v1156_v58 = vrot.slane %v2123_v53, %v3274_v36  ;;  %v1661_v53 = vld [vmem:[%s3414_s8] sm:$0x1] }
 0x413   : > { %v1163_v55 = vrot.slane %v1149_v54, %v3274_v36  ;;  %v2582_v36 = vld [vmem:[#allocation12 + $0x58] sm:$0xff]  }
 0x415   : > { %1539 = vmatprep.mubr.bf16.mxu1 %v1163_v55  ;;  %1580 = vmatprep.mubr.bf16.mxu0 %v1163_v55 }
 0x416   : > { %1540 = vmatmul.mubr.bf16.vlgmr.msra.gmra.mrb[8].mxu1 %v1156_v58  ;;  %1581 = vmatmul.mubr.bf16.vlgmr.msra.gmra.mrb[24].mxu0 %v1156_v58 }
 0x417   : > { %2242 = vmatpush3.bf16.msra.mxu1 %v2572_v56  ;;  %2264 = vmatpush3.bf16.msra.mxu0 %v2573_v57 }
 0x418   : > { %2243 = vmatprep.subr.bf16.mxu1 %v2574_v61  ;;  %2265 = vmatprep.subr.bf16.mxu0 %v2575_v62 }
 0x41b   : > { %2244 = vmatpush3.bf16.msra.mxu1 %v2576_v59  ;;  %2266 = vmatpush3.bf16.msra.mxu0 %v2577_v60 }
 0x41c   : > { %2245 = vmatprep.subr.bf16.mxu1 %v2578_v63  ;;  %2267 = vmatprep.subr.bf16.mxu0 %v2579_v0 }
 0x41f   : > { %2246 = vmatpush3.bf16.msra.mxu1 %v2580_v1  ;;  %2268 = vmatpush3.bf16.msra.mxu0 %v2581_v2 }
 0x420   : > { %2247 = vmatprep.subr.bf16.mxu1 %v2582_v36  ;;  %2269 = vmatprep.subr.bf16.mxu0 %v2583_v3 }
 0x423   : > { %2248 = vmatpush3.bf16.msra.mxu1 %v2584_v4  ;;  %2270 = vmatpush3.bf16.msra.mxu0 %v2585_v5 }
 0x424   : > { %2249 = vmatprep.subr.bf16.mxu1 %v2586_v6  ;;  %2271 = vmatprep.subr.bf16.mxu0 %v2587_v7 }
 0x427   : > { %2250 = vmatpush3.bf16.msra.mxu1 %v2588_v8  ;;  %2272 = vmatpush3.bf16.msra.mxu0 %v2589_v9 }
 0x428   : > { %2251 = vmatprep.subr.bf16.mxu1 %v2590_v10  ;;  %2273 = vmatprep.subr.bf16.mxu0 %v2591_v11 }
 0x42b   : > { %2252 = vmatpush3.bf16.msra.mxu1 %v2592_v12  ;;  %2274 = vmatpush3.bf16.msra.mxu0 %v2593_v13 }
 0x42c   : > { %2253 = vmatprep.subr.bf16.mxu1 %v2594_v15  ;;  %2275 = vmatprep.subr.bf16.mxu0 %v2595_v16 }
 0x42f   : > { %2254 = vmatpush3.bf16.msra.mxu1 %v2596_v17  ;;  %2276 = vmatpush3.bf16.msra.mxu0 %v2597_v18 }
 0x430   : > { %2255 = vmatprep.subr.bf16.mxu1 %v2598_v19  ;;  %2277 = vmatprep.subr.bf16.mxu0 %v2599_v20 }
 0x433   : > { %2256 = vmatpush3.bf16.msra.mxu1 %v2600_v21  ;;  %2278 = vmatpush3.bf16.msra.mxu0 %v2601_v22 }
 0x4e9   : > { %v1541_v33 = vpop.f32.mrb[8].mxu1  ;;  %v1582_v34 = vpop.f32.mrb[24].mxu0 }
 0x4ea   : > { %v1542_v35 = vadd.f32 %v1541_v33, %v1490_v27  ;;  %v1583_v37 = vadd.f32 %v1582_v34, %v1498_v29  ;;  %v1543_v38 = vpop.f32.mrb[9].mxu1  ;;  %v1584_v39 = vpop.f32.mrb[25].mxu0 }
 0x4eb   : > { %v1544_v40 = vadd.f32 %v1543_v38, %v1494_v30  ;;  %v1585_v41 = vadd.f32 %v1584_v39, %v1502_v32  ;;  %v1545_v42 = vpop.f32.mrb[10].mxu1  ;;  %v1586_v14 = vpop.f32.mrb[26].mxu0 }
 0x4ec   : > { %v1589_v43 = vmax.f32 %v1542_v35, 0.0  ;;  %v1591_v44 = vmax.f32 %v1583_v37, 0.0  ;;  %v1546_v45 = vpop.f32.mrb[11].mxu1  ;;  %v1587_v46 = vpop.f32.mrb[27].mxu0 }
 0x4ed   : > { %v1590_v28 = vmax.f32 %v1544_v40, 0.0  ;;  %v1592_v47 = vmax.f32 %v1585_v41, 0.0 }
 0x4ee   : > { %v1593_v49 = vpack.c.bf16 %v1589_v43, %v1589_v43  ;;  %v1595_v50 = vpack.c.bf16 %v1591_v44, %v1591_v44 }
 0x4ef   : > { %v1594_v31 = vpack.c.bf16 %v1590_v28, %v1590_v28  ;;  %v1596_v48 = vpack.c.bf16 %v1592_v47, %v1592_v47 }
 0x4f1   : > { %1886 = vmatprep.mubr.bf16.mxu1 %v1594_v31  ;;  %1926 = vmatprep.mubr.bf16.mxu0 %v1596_v48 }
 0x4f2   : > { %1887 = vmatmul.mubr.bf16.vlgmr.msra.gmra.mrb[12].mxu1 %v1593_v49  ;;  %1927 = vmatmul.mubr.bf16.vlgmr.msra.gmra.mrb[28].mxu0 %v1595_v50 }
 0x5c5   : > { %v2257_v51 = vpop.f32.mrb[12].mxu1  ;;  %v2279_v52 = vpop.f32.mrb[28].mxu0 }
 0x5c6   : > { %v2258_v54 = vpop.f32.mrb[13].mxu1  ;;  %v2280_v55 = vpop.f32.mrb[29].mxu0 }
 0x5c7   : > { %v2259_v56 = vadd.f32 %v2258_v54, %v2257_v51  ;;  %v2281_v57 = vadd.f32 %v2280_v55, %v2279_v52  ;;  %v2260_v58 = vpop.f32.mrb[14].mxu1  ;;  %v2282_v61 = vpop.f32.mrb[30].mxu0 }
 0x5c8   : > { %v2261_v62 = vpop.f32.mrb[15].mxu1  ;;  %v2283_v59 = vpop.f32.mrb[31].mxu0 }
 0x5c9   : > { %v1889_v60 = vadd.f32 %v2259_v56, %v1661_v53 }
 0x5cb   : > { %v1929_v63 = vadd.f32 %v2281_v57, %v1889_v60 }
 0x5cd   : > { %2602 = vtanh.f32 %v1929_v63 }
 0x5d7   : > { %v2603_v0 = vpop.eup %2602 }
 0x5d8   : > { %1935 = vst [vmem:[%s491_s11] sm:$0x1] %v2603_v0 }
 0x5d9   : > { %2787 = shalt.err (!%p2784_p8)
}
 0x5da   : > { %s2788_s29 = scalar_lea.hbm %s3312_s13, 16  ;;  %s2792_s8 = scalar_lea.hbm %s3415_s23, 32 }
 0x5db   : > { %p2789_p1 = scmp.ne.s32.totalorder %s3312_s13, %s2788_s29  ;;  %p2793_p0 = scmp.lt.u32.totalorder %s3312_s13, %s3415_s23 }
 0x5dc   : > { %p2794_p11 = scmp.lt.u32.totalorder %s2792_s8, %s2788_s29  ;;  %p2796_p6 = scmp.lt.u32.totalorder %s2788_s29, %s3312_s13 }
 0x5dd   : > { %p2790_p12 = pnand %p2789_p1, %p3416_p5 }
 0x5de   : > { %p2795_p7 = por %p2794_p11, %p2793_p0 }
 0x5df   : > { %p2791_p13 = pneg %p2790_p12 }
 0x5e0   : > { %p2797_p10 = por %p2796_p6, %p2795_p7 }
 0x5e2   : > { %p2798_p3 = pnand %p2797_p10, %p2791_p13 }
 0x5e4   : > { %2801 = shalt.err (!%p2798_p3)
}
 0x5e5   : > { %2341 = dma.vmem_to_hbm [thread:$0]  (%p3416_p5), %s3314_s24, 16, %s3312_s13, %s1937_s5  }
 0x5e6 PF: > { %s1961_s25 = sand.u32 1, %s2848_s17   ;;  %p3417_p2 = scmp.ne.s32.totalorder %s3404_s27, 0 }
 0x5e7   : > { %p3418_p4 = scmp.ge.s32.totalorder %s2868_s22, 2  ;;  %s1962_s1 = scalar_lea.sflag [#allocation5], %s1961_s25 }
 0x5e9   : > { %p2364_p9 = pnand %p3418_p4, %p3417_p2 }
 0x5eb   : > { %2843 = dma.done.wait (!%p2364_p9), %s1962_s1, 16  }
 0x5ec   : > { %2845 = vsyncadd (!%p2364_p9), %s1962_s1, 4294967280  ;;  %s30_s22 = sadd.s32 1, %s2868_s22   ;;  %s3419_s17 = smov %s2852_s18 }
 0x5ed   : > { %p27_p8 = scmp.ge.s32.totalorder %s30_s22, 4   ;;  %s3420_s18 = smov %s2856_s19 }
 0x5ee   : > { %s3421_s19 = smov %s3153_s12  ;;  %s3422_s20 = smov %s2864_s21 }
 0x5ef   : > { %s3423_s21 = smov %s3425_s26  ;;  %29 = sbr.rel (!%p27_p8) target bundleno = 16 (0x10), region = 137 }
 0x5f6   :  { %1966 = vsyncpa [#allocation4], 1 }
 0x5f7   :  { %1968 = vsyncpa [#allocation4 + $0x1], 1 }
 0x5f8   :  { %1969 = vsyncpa [#allocation7], 1 }
 0x5f9   :  { %1970 = vsyncpa [#allocation10], 1 }
 0x5fa   :  { %1971 = vsyncpa [#allocation13], 1 }
 0x5fb   :  { %1972 = vsyncpa [#allocation5], 1 }
 0x5fc   :  { %1974 = vsyncpa [#allocation5 + $0x1], 1 }

</bundles_post_ra>
